<compile_context>
chip_gen: v6e
topology: v6e:2x2x1
jax: 0.10.0
libtpu: 0.0.40
codegen_flags: <defaults>
</compile_context>

<pallas_src>
import math
import jax
import jax.numpy as jnp
from jax.experimental import pallas as pl
from jax.experimental.pallas import tpu as pltpu

# ---- model dims (small, deterministic) ----
B, S, H = 2, 8, 32           # batch, seq, hidden
NH = 4                       # attention heads
HD = H // NH                 # head dim = 8
I = 64                       # intermediate (MLP) size
L = 2                        # num_hidden_layers
BS = B * S                   # flattened batch*seq rows = 16
VOCAB = 128
MAXPOS = 64
EPS = 1e-5                   # layer_norm_eps
STD = 0.02                   # initializer_range


def _layernorm(x, w, b):
    mu = jnp.mean(x, axis=-1, keepdims=True)
    var = jnp.mean((x - mu) ** 2, axis=-1, keepdims=True)
    return (x - mu) * jax.lax.rsqrt(var + EPS) * w + b


def consyn_kernel(h_ref, bias_ref, wqkv_ref, w1_ref, w2_ref, vb_ref, out_ref):
    """Single invocation: all B*S rows through ALL layers + ln_f."""
    f32, bf16 = jnp.float32, jnp.bfloat16
    h = h_ref[...]                        # (BS, H) f32 running hidden state
    attn_bias = bias_ref[...]             # (BS, BS) f32: 0 allowed / -1e9 masked
    scale = 1.0 / math.sqrt(HD)

    for l in range(L):                    # statically unrolled layers
        vb = vb_ref[l]                    # (8, 128) f32 packed vectors/biases
        ln1w, ln1b = vb[0:1, 0:H], vb[1:2, 0:H]
        ln2w, ln2b = vb[2:3, 0:H], vb[3:4, 0:H]
        bo,   b2   = vb[4:5, 0:H], vb[5:6, 0:H]
        bq,   bk   = vb[0:1, H:2 * H], vb[1:2, H:2 * H]
        b1         = vb[0:1, 2 * H:2 * H + I]

        # ---------------- self-attention (pre-LN + residual) ----------------
        x = _layernorm(h, ln1w, ln1b)
        qkv = jnp.dot(x.astype(bf16), wqkv_ref[l],
                      preferred_element_type=f32)            # (BS, 2H + NH*H)
        # cast once per layer, slice bf16 afterwards
        qb = ((qkv[:, 0:H] + bq) * scale).astype(bf16)       # (BS, H)
        kb = (qkv[:, H:2 * H] + bk).astype(bf16)             # (BS, H)
        vpb = qkv[:, 2 * H:].astype(bf16)                    # (BS, NH*H), V·Wo folded

        attn = jnp.zeros((BS, H), f32)
        for hh in range(NH):                                 # static head unroll
            # TODO(synk): causal attention assumed (MultiHeadAttention source
            # not provided); attention_mask=None so no padding mask.
            s = jnp.einsum('qd,kd->qk',
                           qb[:, hh * HD:(hh + 1) * HD],
                           kb[:, hh * HD:(hh + 1) * HD],
                           preferred_element_type=f32)       # (BS, BS)
            s = s + attn_bias                                # same-batch & causal
            e = jnp.exp(s - jnp.max(s, axis=-1, keepdims=True))
            p = e * pl.reciprocal(jnp.sum(e, axis=-1, keepdims=True),
                                  approx=True)
            # W_o already folded into vpb -> accumulate projected context directly
            attn = attn + jnp.dot(p.astype(bf16),
                                  vpb[:, hh * H:(hh + 1) * H],
                                  preferred_element_type=f32)
        h = h + attn + bo          # bo = b_o + sum_h b_v[h] @ W_o[h]  (== 0 here)

        # ---------------- MLP (pre-LN + residual) ---------------------------
        x = _layernorm(h, ln2w, ln2b)
        z = jnp.dot(x.astype(bf16), w1_ref[l], preferred_element_type=f32) + b1
        # TODO(synk): torch nn.GELU default is exact erf; tanh approx used here.
        z = jax.nn.gelu(z, approximate=True)
        h = h + jnp.dot(z.astype(bf16), w2_ref[l],
                        preferred_element_type=f32) + b2

    # ---------------- final LayerNorm (ln_f) --------------------------------
    vb0 = vb_ref[0]
    out_ref[...] = _layernorm(h, vb0[6:7, 0:H], vb0[7:8, 0:H])


def _make_attn_bias():
    """(BS, BS) additive mask: 0 where same batch AND causal, else -1e9."""
    tok = jnp.arange(BS)
    same_b = (tok[:, None] // S) == (tok[None, :] // S)
    causal = (tok[:, None] % S) >= (tok[None, :] % S)
    return jnp.where(same_b & causal, 0.0, -1e9).astype(jnp.float32)


def consyn_forward(inputs_embeds, p):
    """Full L-layer stack + ln_f in a single pallas_call, single grid step."""
    h_flat = inputs_embeds.reshape(BS, H).astype(jnp.float32)
    attn_bias = _make_attn_bias()

    def full(shape):
        return pl.BlockSpec(shape, lambda *_: (0,) * len(shape))

    grid_spec = pltpu.PrefetchScalarGridSpec(
        num_scalar_prefetch=0,
        grid=(1,),
        in_specs=[
            full((BS, H)),                  # hidden states (batch flattened)
            full((BS, BS)),                 # same-batch & causal additive mask
            full(p['w_qkvo'].shape),        # (L, H, 2H+NH*H) bf16
            full(p['w_1'].shape),           # (L, H, I) bf16
            full(p['w_2'].shape),           # (L, I, H) bf16
            full(p['vecbias'].shape),       # (L, 8, 128) f32
        ],
        out_specs=full((BS, H)),
    )
    out = pl.pallas_call(
        consyn_kernel,
        out_shape=jax.ShapeDtypeStruct((BS, H), jnp.float32),
        grid_spec=grid_spec,
        compiler_params=pltpu.CompilerParams(
            dimension_semantics=("arbitrary",)),
    )(h_flat, attn_bias, p['w_qkvo'], p['w_1'], p['w_2'], p['vecbias'])
    return out.reshape(B, S, H)


def init_params(key):
    """Deterministic init matching ConsynModel._init_weights, packed slabs."""
    ks = jax.random.split(key, 8)
    nrm = lambda k, shp: jax.random.normal(k, shp, jnp.float32) * STD

    wq = nrm(ks[0], (L, H, H))
    wk = nrm(ks[1], (L, H, H))
    wv = nrm(ks[2], (L, H, H))
    wo = nrm(ks[3], (L, H, H))
    # Fold W_o into W_v per head (f32 product, single bf16 cast):
    #   W_vo[l][:, h*H:(h+1)*H] = W_v[l][:, h*HD:(h+1)*HD] @ W_o[l][h*HD:(h+1)*HD, :]
    w_vo = jnp.stack([
        jnp.concatenate(
            [wv[l, :, hh * HD:(hh + 1) * HD] @ wo[l, hh * HD:(hh + 1) * HD, :]
             for hh in range(NH)], axis=-1)
        for l in range(L)], axis=0)                          # (L, H, NH*H) f32
    w_qkvo = jnp.concatenate([wq, wk, w_vo], axis=-1).astype(jnp.bfloat16)

    w_1 = nrm(ks[4], (L, H, I)).astype(jnp.bfloat16)
    w_2 = nrm(ks[5], (L, I, H)).astype(jnp.bfloat16)

    # Packed (L, 8, 128) f32 slab. Per _init_weights: LN weight = 1, every
    # Linear/LN bias = 0.  Layout:
    #   lanes 0:H,    rows 0..7 : ln1w ln1b ln2w ln2b bo_eff b2 lnf_w lnf_b
    #   lanes H:2H,   row 0 / 1 : b_q / b_k
    #   lanes 2H:2H+I, row 0    : b_1
    vecbias = jnp.zeros((L, 8, 128), jnp.float32)
    vecbias = vecbias.at[:, 0, 0:H].set(1.0)   # ln1 weight
    vecbias = vecbias.at[:, 2, 0:H].set(1.0)   # ln2 weight
    vecbias = vecbias.at[0, 6, 0:H].set(1.0)   # ln_f weight (packed in layer 0)

    return {
        # embeddings (nn.Embedding -> normal(0, initializer_range))
        'word_emb': nrm(ks[6], (VOCAB, H)),
        'pos_emb':  nrm(ks[7], (MAXPOS, H)),
        'w_qkvo': w_qkvo, 'w_1': w_1, 'w_2': w_2, 'vecbias': vecbias,
    }


if __name__ == "__main__":
    key = jax.random.PRNGKey(0)
    k_param, k_ids = jax.random.split(key)
    params = init_params(k_param)

    # forward(input_ids) with attention_mask=None, past_key_values=None
    input_ids = jax.random.randint(k_ids, (B, S), 0, VOCAB)
    position_ids = jnp.broadcast_to(jnp.arange(S, dtype=jnp.int32)[None, :],
                                    (B, S))

    # glue: embedding gather in plain JAX (word + position embeddings)
    inputs_embeds = (params['word_emb'][input_ids]
                     + params['pos_emb'][position_ids])      # (B, S, H) f32

    last_hidden_state = consyn_forward(inputs_embeds, params)
    jax.block_until_ready(last_hidden_state)

    assert last_hidden_state.shape == (B, S, H)
    assert bool(jnp.all(jnp.isfinite(last_hidden_state)))
    print("KERNEL_OK")
</pallas_src>

<mosaic_0001>
module attributes {stable_mosaic.version = 11 : i64} {
  func.func @consyn_kernel(%arg0: i32, %arg1: memref<16x32xf32, #tpu.memory_space<vmem>>, %arg2: memref<16x16xf32, #tpu.memory_space<vmem>>, %arg3: memref<2x32x192xbf16, #tpu.memory_space<vmem>>, %arg4: memref<2x32x64xbf16, #tpu.memory_space<vmem>>, %arg5: memref<2x64x32xbf16, #tpu.memory_space<vmem>>, %arg6: memref<2x8x128xf32, #tpu.memory_space<vmem>>, %arg7: memref<16x32xf32, #tpu.memory_space<vmem>>) attributes {dimension_semantics = [#tpu.dimension_semantics<arbitrary>], iteration_bounds = array<i64: 1>, scalar_prefetch = 0 : i64, scratch_operands = 0 : i64, tpu.core_type = #tpu.core_type<tc>, window_params = [{pipeline_mode = #tpu.pipeline_mode<synchronous>, transform_indices = @transform_0, window_bounds = array<i64: 16, 32>}, {pipeline_mode = #tpu.pipeline_mode<synchronous>, transform_indices = @transform_1, window_bounds = array<i64: 16, 16>}, {pipeline_mode = #tpu.pipeline_mode<synchronous>, transform_indices = @transform_2, window_bounds = array<i64: 2, 32, 192>}, {pipeline_mode = #tpu.pipeline_mode<synchronous>, transform_indices = @transform_3, window_bounds = array<i64: 2, 32, 64>}, {pipeline_mode = #tpu.pipeline_mode<synchronous>, transform_indices = @transform_4, window_bounds = array<i64: 2, 64, 32>}, {pipeline_mode = #tpu.pipeline_mode<synchronous>, transform_indices = @transform_5, window_bounds = array<i64: 2, 8, 128>}, {pipeline_mode = #tpu.pipeline_mode<synchronous>, transform_indices = @transform_6, window_bounds = array<i64: 16, 32>}]} {
    %c0 = arith.constant 0 : index
    %c0_0 = arith.constant 0 : index
    %0 = vector.load %arg1[%c0, %c0_0] : memref<16x32xf32, #tpu.memory_space<vmem>>, vector<16x32xf32>
    %c0_1 = arith.constant 0 : index
    %c0_2 = arith.constant 0 : index
    %1 = vector.load %arg2[%c0_1, %c0_2] : memref<16x16xf32, #tpu.memory_space<vmem>>, vector<16x16xf32>
    %c0_3 = arith.constant 0 : index
    %c0_4 = arith.constant 0 : index
    %c0_5 = arith.constant 0 : index
    %2 = vector.load %arg6[%c0_3, %c0_4, %c0_5] : memref<2x8x128xf32, #tpu.memory_space<vmem>>, vector<1x8x128xf32>
    %3 = vector.shape_cast %2 : vector<1x8x128xf32> to vector<8x128xf32>
    %4 = vector.extract_strided_slice %3 {offsets = [0, 0], sizes = [1, 32], strides = [1, 1]} : vector<8x128xf32> to vector<1x32xf32>
    %5 = vector.extract_strided_slice %3 {offsets = [1, 0], sizes = [1, 32], strides = [1, 1]} : vector<8x128xf32> to vector<1x32xf32>
    %6 = vector.extract_strided_slice %3 {offsets = [2, 0], sizes = [1, 32], strides = [1, 1]} : vector<8x128xf32> to vector<1x32xf32>
    %7 = vector.extract_strided_slice %3 {offsets = [3, 0], sizes = [1, 32], strides = [1, 1]} : vector<8x128xf32> to vector<1x32xf32>
    %8 = vector.extract_strided_slice %3 {offsets = [4, 0], sizes = [1, 32], strides = [1, 1]} : vector<8x128xf32> to vector<1x32xf32>
    %9 = vector.extract_strided_slice %3 {offsets = [5, 0], sizes = [1, 32], strides = [1, 1]} : vector<8x128xf32> to vector<1x32xf32>
    %10 = vector.extract_strided_slice %3 {offsets = [0, 32], sizes = [1, 32], strides = [1, 1]} : vector<8x128xf32> to vector<1x32xf32>
    %11 = vector.extract_strided_slice %3 {offsets = [1, 32], sizes = [1, 32], strides = [1, 1]} : vector<8x128xf32> to vector<1x32xf32>
    %12 = vector.extract_strided_slice %3 {offsets = [0, 64], sizes = [1, 64], strides = [1, 1]} : vector<8x128xf32> to vector<1x64xf32>
    %cst = arith.constant dense<0.000000e+00> : vector<16xf32>
    %13 = vector.multi_reduction <add>, %0, %cst [1] : vector<16x32xf32> to vector<16xf32>
    %14 = vector.shape_cast %13 : vector<16xf32> to vector<16x1xf32>
    %cst_6 = arith.constant 3.200000e+01 : f32
    %15 = vector.broadcast %cst_6 : f32 to vector<16x1xf32>
    %16 = arith.divf %14, %15 : vector<16x1xf32>
    %17 = vector.broadcast %16 : vector<16x1xf32> to vector<16x32xf32>
    %18 = arith.subf %0, %17 : vector<16x32xf32>
    %19 = arith.mulf %18, %18 : vector<16x32xf32>
    %cst_7 = arith.constant dense<0.000000e+00> : vector<16xf32>
    %20 = vector.multi_reduction <add>, %19, %cst_7 [1] : vector<16x32xf32> to vector<16xf32>
    %21 = vector.shape_cast %20 : vector<16xf32> to vector<16x1xf32>
    %cst_8 = arith.constant 3.200000e+01 : f32
    %22 = vector.broadcast %cst_8 : f32 to vector<16x1xf32>
    %23 = arith.divf %21, %22 : vector<16x1xf32>
    %24 = vector.broadcast %16 : vector<16x1xf32> to vector<16x32xf32>
    %25 = arith.subf %0, %24 : vector<16x32xf32>
    %cst_9 = arith.constant 9.99999974E-6 : f32
    %26 = vector.broadcast %cst_9 : f32 to vector<16x1xf32>
    %27 = arith.addf %23, %26 : vector<16x1xf32>
    %28 = math.rsqrt %27 : vector<16x1xf32>
    %29 = vector.broadcast %28 : vector<16x1xf32> to vector<16x32xf32>
    %30 = arith.mulf %25, %29 : vector<16x32xf32>
    %31 = vector.broadcast %4 : vector<1x32xf32> to vector<16x32xf32>
    %32 = arith.mulf %30, %31 : vector<16x32xf32>
    %33 = vector.broadcast %5 : vector<1x32xf32> to vector<16x32xf32>
    %34 = arith.addf %32, %33 : vector<16x32xf32>
    %35 = arith.truncf %34 : vector<16x32xf32> to vector<16x32xbf16>
    %c0_10 = arith.constant 0 : index
    %c0_11 = arith.constant 0 : index
    %c0_12 = arith.constant 0 : index
    %36 = vector.load %arg3[%c0_10, %c0_11, %c0_12] : memref<2x32x192xbf16, #tpu.memory_space<vmem>>, vector<1x32x192xbf16>
    %37 = vector.shape_cast %36 : vector<1x32x192xbf16> to vector<32x192xbf16>
    %cst_13 = arith.constant dense<0.000000e+00> : vector<16x192xf32>
    %38 = tpu.matmul %35, %37, %cst_13 {dimension_numbers = #tpu.dot_dimension_numbers<[1], [0], [0], [1], [0, 0, 1, 1], [], []>} : vector<16x32xbf16>, vector<32x192xbf16>, vector<16x192xf32> -> vector<16x192xf32>
    %39 = vector.extract_strided_slice %38 {offsets = [0, 0], sizes = [16, 32], strides = [1, 1]} : vector<16x192xf32> to vector<16x32xf32>
    %40 = vector.broadcast %10 : vector<1x32xf32> to vector<16x32xf32>
    %41 = arith.addf %39, %40 : vector<16x32xf32>
    %cst_14 = arith.constant 0.353553385 : f32
    %42 = vector.broadcast %cst_14 : f32 to vector<16x32xf32>
    %43 = arith.mulf %41, %42 : vector<16x32xf32>
    %44 = arith.truncf %43 : vector<16x32xf32> to vector<16x32xbf16>
    %45 = vector.extract_strided_slice %38 {offsets = [0, 32], sizes = [16, 32], strides = [1, 1]} : vector<16x192xf32> to vector<16x32xf32>
    %46 = vector.broadcast %11 : vector<1x32xf32> to vector<16x32xf32>
    %47 = arith.addf %45, %46 : vector<16x32xf32>
    %48 = arith.truncf %47 : vector<16x32xf32> to vector<16x32xbf16>
    %49 = vector.extract_strided_slice %38 {offsets = [0, 64], sizes = [16, 128], strides = [1, 1]} : vector<16x192xf32> to vector<16x128xf32>
    %50 = arith.truncf %49 : vector<16x128xf32> to vector<16x128xbf16>
    %cst_15 = arith.constant 0.000000e+00 : f32
    %51 = vector.broadcast %cst_15 : f32 to vector<16x32xf32>
    %52 = vector.extract_strided_slice %44 {offsets = [0, 0], sizes = [16, 8], strides = [1, 1]} : vector<16x32xbf16> to vector<16x8xbf16>
    %53 = vector.extract_strided_slice %48 {offsets = [0, 0], sizes = [16, 8], strides = [1, 1]} : vector<16x32xbf16> to vector<16x8xbf16>
    "tpu.trace_start"() <{level = 10 : i32, message = "qd,kd->qk"}> : () -> ()
    %cst_16 = arith.constant dense<0.000000e+00> : vector<16x16xf32>
    %54 = tpu.matmul %52, %53, %cst_16 {dimension_numbers = #tpu.dot_dimension_numbers<[1], [1], [0], [0], [0, 0, 1, 0], [], []>} : vector<16x8xbf16>, vector<16x8xbf16>, vector<16x16xf32> -> vector<16x16xf32>
    "tpu.trace_stop"() : () -> ()
    %55 = arith.addf %54, %1 : vector<16x16xf32>
    %cst_17 = arith.constant dense<0xFF800000> : vector<16xf32>
    %56 = vector.multi_reduction <maximumf>, %55, %cst_17 [1] : vector<16x16xf32> to vector<16xf32>
    %57 = vector.shape_cast %56 : vector<16xf32> to vector<16x1xf32>
    %58 = vector.broadcast %57 : vector<16x1xf32> to vector<16x16xf32>
    %59 = arith.subf %55, %58 : vector<16x16xf32>
    %60 = math.exp %59 : vector<16x16xf32>
    %cst_18 = arith.constant dense<0.000000e+00> : vector<16xf32>
    %61 = vector.multi_reduction <add>, %60, %cst_18 [1] : vector<16x16xf32> to vector<16xf32>
    %62 = vector.shape_cast %61 : vector<16xf32> to vector<16x1xf32>
    %63 = tpu.reciprocal %62 {approx = true} : vector<16x1xf32> -> vector<16x1xf32>
    %64 = vector.broadcast %63 : vector<16x1xf32> to vector<16x16xf32>
    %65 = arith.mulf %60, %64 : vector<16x16xf32>
    %66 = arith.truncf %65 : vector<16x16xf32> to vector<16x16xbf16>
    %67 = vector.extract_strided_slice %50 {offsets = [0, 0], sizes = [16, 32], strides = [1, 1]} : vector<16x128xbf16> to vector<16x32xbf16>
    %cst_19 = arith.constant dense<0.000000e+00> : vector<16x32xf32>
    %68 = tpu.matmul %66, %67, %cst_19 {dimension_numbers = #tpu.dot_dimension_numbers<[1], [0], [0], [1], [0, 0, 1, 1], [], []>} : vector<16x16xbf16>, vector<16x32xbf16>, vector<16x32xf32> -> vector<16x32xf32>
    %69 = arith.addf %51, %68 : vector<16x32xf32>
    %70 = vector.extract_strided_slice %44 {offsets = [0, 8], sizes = [16, 8], strides = [1, 1]} : vector<16x32xbf16> to vector<16x8xbf16>
    %71 = vector.extract_strided_slice %48 {offsets = [0, 8], sizes = [16, 8], strides = [1, 1]} : vector<16x32xbf16> to vector<16x8xbf16>
    "tpu.trace_start"() <{level = 10 : i32, message = "qd,kd->qk"}> : () -> ()
    %cst_20 = arith.constant dense<0.000000e+00> : vector<16x16xf32>
    %72 = tpu.matmul %70, %71, %cst_20 {dimension_numbers = #tpu.dot_dimension_numbers<[1], [1], [0], [0], [0, 0, 1, 0], [], []>} : vector<16x8xbf16>, vector<16x8xbf16>, vector<16x16xf32> -> vector<16x16xf32>
    "tpu.trace_stop"() : () -> ()
    %73 = arith.addf %72, %1 : vector<16x16xf32>
    %cst_21 = arith.constant dense<0xFF800000> : vector<16xf32>
    %74 = vector.multi_reduction <maximumf>, %73, %cst_21 [1] : vector<16x16xf32> to vector<16xf32>
    %75 = vector.shape_cast %74 : vector<16xf32> to vector<16x1xf32>
    %76 = vector.broadcast %75 : vector<16x1xf32> to vector<16x16xf32>
    %77 = arith.subf %73, %76 : vector<16x16xf32>
    %78 = math.exp %77 : vector<16x16xf32>
    %cst_22 = arith.constant dense<0.000000e+00> : vector<16xf32>
    %79 = vector.multi_reduction <add>, %78, %cst_22 [1] : vector<16x16xf32> to vector<16xf32>
    %80 = vector.shape_cast %79 : vector<16xf32> to vector<16x1xf32>
    %81 = tpu.reciprocal %80 {approx = true} : vector<16x1xf32> -> vector<16x1xf32>
    %82 = vector.broadcast %81 : vector<16x1xf32> to vector<16x16xf32>
    %83 = arith.mulf %78, %82 : vector<16x16xf32>
    %84 = arith.truncf %83 : vector<16x16xf32> to vector<16x16xbf16>
    %85 = vector.extract_strided_slice %50 {offsets = [0, 32], sizes = [16, 32], strides = [1, 1]} : vector<16x128xbf16> to vector<16x32xbf16>
    %cst_23 = arith.constant dense<0.000000e+00> : vector<16x32xf32>
    %86 = tpu.matmul %84, %85, %cst_23 {dimension_numbers = #tpu.dot_dimension_numbers<[1], [0], [0], [1], [0, 0, 1, 1], [], []>} : vector<16x16xbf16>, vector<16x32xbf16>, vector<16x32xf32> -> vector<16x32xf32>
    %87 = arith.addf %69, %86 : vector<16x32xf32>
    %88 = vector.extract_strided_slice %44 {offsets = [0, 16], sizes = [16, 8], strides = [1, 1]} : vector<16x32xbf16> to vector<16x8xbf16>
    %89 = vector.extract_strided_slice %48 {offsets = [0, 16], sizes = [16, 8], strides = [1, 1]} : vector<16x32xbf16> to vector<16x8xbf16>
    "tpu.trace_start"() <{level = 10 : i32, message = "qd,kd->qk"}> : () -> ()
    %cst_24 = arith.constant dense<0.000000e+00> : vector<16x16xf32>
    %90 = tpu.matmul %88, %89, %cst_24 {dimension_numbers = #tpu.dot_dimension_numbers<[1], [1], [0], [0], [0, 0, 1, 0], [], []>} : vector<16x8xbf16>, vector<16x8xbf16>, vector<16x16xf32> -> vector<16x16xf32>
    "tpu.trace_stop"() : () -> ()
    %91 = arith.addf %90, %1 : vector<16x16xf32>
    %cst_25 = arith.constant dense<0xFF800000> : vector<16xf32>
    %92 = vector.multi_reduction <maximumf>, %91, %cst_25 [1] : vector<16x16xf32> to vector<16xf32>
    %93 = vector.shape_cast %92 : vector<16xf32> to vector<16x1xf32>
    %94 = vector.broadcast %93 : vector<16x1xf32> to vector<16x16xf32>
    %95 = arith.subf %91, %94 : vector<16x16xf32>
    %96 = math.exp %95 : vector<16x16xf32>
    %cst_26 = arith.constant dense<0.000000e+00> : vector<16xf32>
    %97 = vector.multi_reduction <add>, %96, %cst_26 [1] : vector<16x16xf32> to vector<16xf32>
    %98 = vector.shape_cast %97 : vector<16xf32> to vector<16x1xf32>
    %99 = tpu.reciprocal %98 {approx = true} : vector<16x1xf32> -> vector<16x1xf32>
    %100 = vector.broadcast %99 : vector<16x1xf32> to vector<16x16xf32>
    %101 = arith.mulf %96, %100 : vector<16x16xf32>
    %102 = arith.truncf %101 : vector<16x16xf32> to vector<16x16xbf16>
    %103 = vector.extract_strided_slice %50 {offsets = [0, 64], sizes = [16, 32], strides = [1, 1]} : vector<16x128xbf16> to vector<16x32xbf16>
    %cst_27 = arith.constant dense<0.000000e+00> : vector<16x32xf32>
    %104 = tpu.matmul %102, %103, %cst_27 {dimension_numbers = #tpu.dot_dimension_numbers<[1], [0], [0], [1], [0, 0, 1, 1], [], []>} : vector<16x16xbf16>, vector<16x32xbf16>, vector<16x32xf32> -> vector<16x32xf32>
    %105 = arith.addf %87, %104 : vector<16x32xf32>
    %106 = vector.extract_strided_slice %44 {offsets = [0, 24], sizes = [16, 8], strides = [1, 1]} : vector<16x32xbf16> to vector<16x8xbf16>
    %107 = vector.extract_strided_slice %48 {offsets = [0, 24], sizes = [16, 8], strides = [1, 1]} : vector<16x32xbf16> to vector<16x8xbf16>
    "tpu.trace_start"() <{level = 10 : i32, message = "qd,kd->qk"}> : () -> ()
    %cst_28 = arith.constant dense<0.000000e+00> : vector<16x16xf32>
    %108 = tpu.matmul %106, %107, %cst_28 {dimension_numbers = #tpu.dot_dimension_numbers<[1], [1], [0], [0], [0, 0, 1, 0], [], []>} : vector<16x8xbf16>, vector<16x8xbf16>, vector<16x16xf32> -> vector<16x16xf32>
    "tpu.trace_stop"() : () -> ()
    %109 = arith.addf %108, %1 : vector<16x16xf32>
    %cst_29 = arith.constant dense<0xFF800000> : vector<16xf32>
    %110 = vector.multi_reduction <maximumf>, %109, %cst_29 [1] : vector<16x16xf32> to vector<16xf32>
    %111 = vector.shape_cast %110 : vector<16xf32> to vector<16x1xf32>
    %112 = vector.broadcast %111 : vector<16x1xf32> to vector<16x16xf32>
    %113 = arith.subf %109, %112 : vector<16x16xf32>
    %114 = math.exp %113 : vector<16x16xf32>
    %cst_30 = arith.constant dense<0.000000e+00> : vector<16xf32>
    %115 = vector.multi_reduction <add>, %114, %cst_30 [1] : vector<16x16xf32> to vector<16xf32>
    %116 = vector.shape_cast %115 : vector<16xf32> to vector<16x1xf32>
    %117 = tpu.reciprocal %116 {approx = true} : vector<16x1xf32> -> vector<16x1xf32>
    %118 = vector.broadcast %117 : vector<16x1xf32> to vector<16x16xf32>
    %119 = arith.mulf %114, %118 : vector<16x16xf32>
    %120 = arith.truncf %119 : vector<16x16xf32> to vector<16x16xbf16>
    %121 = vector.extract_strided_slice %50 {offsets = [0, 96], sizes = [16, 32], strides = [1, 1]} : vector<16x128xbf16> to vector<16x32xbf16>
    %cst_31 = arith.constant dense<0.000000e+00> : vector<16x32xf32>
    %122 = tpu.matmul %120, %121, %cst_31 {dimension_numbers = #tpu.dot_dimension_numbers<[1], [0], [0], [1], [0, 0, 1, 1], [], []>} : vector<16x16xbf16>, vector<16x32xbf16>, vector<16x32xf32> -> vector<16x32xf32>
    %123 = arith.addf %105, %122 : vector<16x32xf32>
    %124 = arith.addf %0, %123 : vector<16x32xf32>
    %125 = vector.broadcast %8 : vector<1x32xf32> to vector<16x32xf32>
    %126 = arith.addf %124, %125 : vector<16x32xf32>
    %cst_32 = arith.constant dense<0.000000e+00> : vector<16xf32>
    %127 = vector.multi_reduction <add>, %126, %cst_32 [1] : vector<16x32xf32> to vector<16xf32>
    %128 = vector.shape_cast %127 : vector<16xf32> to vector<16x1xf32>
    %cst_33 = arith.constant 3.200000e+01 : f32
    %129 = vector.broadcast %cst_33 : f32 to vector<16x1xf32>
    %130 = arith.divf %128, %129 : vector<16x1xf32>
    %131 = vector.broadcast %130 : vector<16x1xf32> to vector<16x32xf32>
    %132 = arith.subf %126, %131 : vector<16x32xf32>
    %133 = arith.mulf %132, %132 : vector<16x32xf32>
    %cst_34 = arith.constant dense<0.000000e+00> : vector<16xf32>
    %134 = vector.multi_reduction <add>, %133, %cst_34 [1] : vector<16x32xf32> to vector<16xf32>
    %135 = vector.shape_cast %134 : vector<16xf32> to vector<16x1xf32>
    %cst_35 = arith.constant 3.200000e+01 : f32
    %136 = vector.broadcast %cst_35 : f32 to vector<16x1xf32>
    %137 = arith.divf %135, %136 : vector<16x1xf32>
    %138 = vector.broadcast %130 : vector<16x1xf32> to vector<16x32xf32>
    %139 = arith.subf %126, %138 : vector<16x32xf32>
    %cst_36 = arith.constant 9.99999974E-6 : f32
    %140 = vector.broadcast %cst_36 : f32 to vector<16x1xf32>
    %141 = arith.addf %137, %140 : vector<16x1xf32>
    %142 = math.rsqrt %141 : vector<16x1xf32>
    %143 = vector.broadcast %142 : vector<16x1xf32> to vector<16x32xf32>
    %144 = arith.mulf %139, %143 : vector<16x32xf32>
    %145 = vector.broadcast %6 : vector<1x32xf32> to vector<16x32xf32>
    %146 = arith.mulf %144, %145 : vector<16x32xf32>
    %147 = vector.broadcast %7 : vector<1x32xf32> to vector<16x32xf32>
    %148 = arith.addf %146, %147 : vector<16x32xf32>
    %149 = arith.truncf %148 : vector<16x32xf32> to vector<16x32xbf16>
    %c0_37 = arith.constant 0 : index
    %c0_38 = arith.constant 0 : index
    %c0_39 = arith.constant 0 : index
    %150 = vector.load %arg4[%c0_37, %c0_38, %c0_39] : memref<2x32x64xbf16, #tpu.memory_space<vmem>>, vector<1x32x64xbf16>
    %151 = vector.shape_cast %150 : vector<1x32x64xbf16> to vector<32x64xbf16>
    %cst_40 = arith.constant dense<0.000000e+00> : vector<16x64xf32>
    %152 = tpu.matmul %149, %151, %cst_40 {dimension_numbers = #tpu.dot_dimension_numbers<[1], [0], [0], [1], [0, 0, 1, 1], [], []>} : vector<16x32xbf16>, vector<32x64xbf16>, vector<16x64xf32> -> vector<16x64xf32>
    %153 = vector.broadcast %12 : vector<1x64xf32> to vector<16x64xf32>
    %154 = arith.addf %152, %153 : vector<16x64xf32>
    %155 = arith.mulf %154, %154 : vector<16x64xf32>
    %156 = arith.mulf %154, %155 : vector<16x64xf32>
    %cst_41 = arith.constant 4.471500e-02 : f32
    %157 = vector.broadcast %cst_41 : f32 to vector<16x64xf32>
    %158 = arith.mulf %157, %156 : vector<16x64xf32>
    %159 = arith.addf %154, %158 : vector<16x64xf32>
    %cst_42 = arith.constant 0.797884583 : f32
    %160 = vector.broadcast %cst_42 : f32 to vector<16x64xf32>
    %161 = arith.mulf %160, %159 : vector<16x64xf32>
    %162 = math.tanh %161 : vector<16x64xf32>
    %cst_43 = arith.constant 1.000000e+00 : f32
    %163 = vector.broadcast %cst_43 : f32 to vector<16x64xf32>
    %164 = arith.addf %163, %162 : vector<16x64xf32>
    %cst_44 = arith.constant 5.000000e-01 : f32
    %165 = vector.broadcast %cst_44 : f32 to vector<16x64xf32>
    %166 = arith.mulf %165, %164 : vector<16x64xf32>
    %167 = arith.mulf %154, %166 : vector<16x64xf32>
    %168 = arith.truncf %167 : vector<16x64xf32> to vector<16x64xbf16>
    %c0_45 = arith.constant 0 : index
    %c0_46 = arith.constant 0 : index
    %c0_47 = arith.constant 0 : index
    %169 = vector.load %arg5[%c0_45, %c0_46, %c0_47] : memref<2x64x32xbf16, #tpu.memory_space<vmem>>, vector<1x64x32xbf16>
    %170 = vector.shape_cast %169 : vector<1x64x32xbf16> to vector<64x32xbf16>
    %cst_48 = arith.constant dense<0.000000e+00> : vector<16x32xf32>
    %171 = tpu.matmul %168, %170, %cst_48 {dimension_numbers = #tpu.dot_dimension_numbers<[1], [0], [0], [1], [0, 0, 1, 1], [], []>} : vector<16x64xbf16>, vector<64x32xbf16>, vector<16x32xf32> -> vector<16x32xf32>
    %172 = arith.addf %126, %171 : vector<16x32xf32>
    %173 = vector.broadcast %9 : vector<1x32xf32> to vector<16x32xf32>
    %174 = arith.addf %172, %173 : vector<16x32xf32>
    %c1 = arith.constant 1 : index
    %c0_49 = arith.constant 0 : index
    %c0_50 = arith.constant 0 : index
    %175 = vector.load %arg6[%c1, %c0_49, %c0_50] : memref<2x8x128xf32, #tpu.memory_space<vmem>>, vector<1x8x128xf32>
    %176 = vector.shape_cast %175 : vector<1x8x128xf32> to vector<8x128xf32>
    %177 = vector.extract_strided_slice %176 {offsets = [0, 0], sizes = [1, 32], strides = [1, 1]} : vector<8x128xf32> to vector<1x32xf32>
    %178 = vector.extract_strided_slice %176 {offsets = [1, 0], sizes = [1, 32], strides = [1, 1]} : vector<8x128xf32> to vector<1x32xf32>
    %179 = vector.extract_strided_slice %176 {offsets = [2, 0], sizes = [1, 32], strides = [1, 1]} : vector<8x128xf32> to vector<1x32xf32>
    %180 = vector.extract_strided_slice %176 {offsets = [3, 0], sizes = [1, 32], strides = [1, 1]} : vector<8x128xf32> to vector<1x32xf32>
    %181 = vector.extract_strided_slice %176 {offsets = [4, 0], sizes = [1, 32], strides = [1, 1]} : vector<8x128xf32> to vector<1x32xf32>
    %182 = vector.extract_strided_slice %176 {offsets = [5, 0], sizes = [1, 32], strides = [1, 1]} : vector<8x128xf32> to vector<1x32xf32>
    %183 = vector.extract_strided_slice %176 {offsets = [0, 32], sizes = [1, 32], strides = [1, 1]} : vector<8x128xf32> to vector<1x32xf32>
    %184 = vector.extract_strided_slice %176 {offsets = [1, 32], sizes = [1, 32], strides = [1, 1]} : vector<8x128xf32> to vector<1x32xf32>
    %185 = vector.extract_strided_slice %176 {offsets = [0, 64], sizes = [1, 64], strides = [1, 1]} : vector<8x128xf32> to vector<1x64xf32>
    %cst_51 = arith.constant dense<0.000000e+00> : vector<16xf32>
    %186 = vector.multi_reduction <add>, %174, %cst_51 [1] : vector<16x32xf32> to vector<16xf32>
    %187 = vector.shape_cast %186 : vector<16xf32> to vector<16x1xf32>
    %cst_52 = arith.constant 3.200000e+01 : f32
    %188 = vector.broadcast %cst_52 : f32 to vector<16x1xf32>
    %189 = arith.divf %187, %188 : vector<16x1xf32>
    %190 = vector.broadcast %189 : vector<16x1xf32> to vector<16x32xf32>
    %191 = arith.subf %174, %190 : vector<16x32xf32>
    %192 = arith.mulf %191, %191 : vector<16x32xf32>
    %cst_53 = arith.constant dense<0.000000e+00> : vector<16xf32>
    %193 = vector.multi_reduction <add>, %192, %cst_53 [1] : vector<16x32xf32> to vector<16xf32>
    %194 = vector.shape_cast %193 : vector<16xf32> to vector<16x1xf32>
    %cst_54 = arith.constant 3.200000e+01 : f32
    %195 = vector.broadcast %cst_54 : f32 to vector<16x1xf32>
    %196 = arith.divf %194, %195 : vector<16x1xf32>
    %197 = vector.broadcast %189 : vector<16x1xf32> to vector<16x32xf32>
    %198 = arith.subf %174, %197 : vector<16x32xf32>
    %cst_55 = arith.constant 9.99999974E-6 : f32
    %199 = vector.broadcast %cst_55 : f32 to vector<16x1xf32>
    %200 = arith.addf %196, %199 : vector<16x1xf32>
    %201 = math.rsqrt %200 : vector<16x1xf32>
    %202 = vector.broadcast %201 : vector<16x1xf32> to vector<16x32xf32>
    %203 = arith.mulf %198, %202 : vector<16x32xf32>
    %204 = vector.broadcast %177 : vector<1x32xf32> to vector<16x32xf32>
    %205 = arith.mulf %203, %204 : vector<16x32xf32>
    %206 = vector.broadcast %178 : vector<1x32xf32> to vector<16x32xf32>
    %207 = arith.addf %205, %206 : vector<16x32xf32>
    %208 = arith.truncf %207 : vector<16x32xf32> to vector<16x32xbf16>
    %c1_56 = arith.constant 1 : index
    %c0_57 = arith.constant 0 : index
    %c0_58 = arith.constant 0 : index
    %209 = vector.load %arg3[%c1_56, %c0_57, %c0_58] : memref<2x32x192xbf16, #tpu.memory_space<vmem>>, vector<1x32x192xbf16>
    %210 = vector.shape_cast %209 : vector<1x32x192xbf16> to vector<32x192xbf16>
    %cst_59 = arith.constant dense<0.000000e+00> : vector<16x192xf32>
    %211 = tpu.matmul %208, %210, %cst_59 {dimension_numbers = #tpu.dot_dimension_numbers<[1], [0], [0], [1], [0, 0, 1, 1], [], []>} : vector<16x32xbf16>, vector<32x192xbf16>, vector<16x192xf32> -> vector<16x192xf32>
    %212 = vector.extract_strided_slice %211 {offsets = [0, 0], sizes = [16, 32], strides = [1, 1]} : vector<16x192xf32> to vector<16x32xf32>
    %213 = vector.broadcast %183 : vector<1x32xf32> to vector<16x32xf32>
    %214 = arith.addf %212, %213 : vector<16x32xf32>
    %cst_60 = arith.constant 0.353553385 : f32
    %215 = vector.broadcast %cst_60 : f32 to vector<16x32xf32>
    %216 = arith.mulf %214, %215 : vector<16x32xf32>
    %217 = arith.truncf %216 : vector<16x32xf32> to vector<16x32xbf16>
    %218 = vector.extract_strided_slice %211 {offsets = [0, 32], sizes = [16, 32], strides = [1, 1]} : vector<16x192xf32> to vector<16x32xf32>
    %219 = vector.broadcast %184 : vector<1x32xf32> to vector<16x32xf32>
    %220 = arith.addf %218, %219 : vector<16x32xf32>
    %221 = arith.truncf %220 : vector<16x32xf32> to vector<16x32xbf16>
    %222 = vector.extract_strided_slice %211 {offsets = [0, 64], sizes = [16, 128], strides = [1, 1]} : vector<16x192xf32> to vector<16x128xf32>
    %223 = arith.truncf %222 : vector<16x128xf32> to vector<16x128xbf16>
    %cst_61 = arith.constant 0.000000e+00 : f32
    %224 = vector.broadcast %cst_61 : f32 to vector<16x32xf32>
    %225 = vector.extract_strided_slice %217 {offsets = [0, 0], sizes = [16, 8], strides = [1, 1]} : vector<16x32xbf16> to vector<16x8xbf16>
    %226 = vector.extract_strided_slice %221 {offsets = [0, 0], sizes = [16, 8], strides = [1, 1]} : vector<16x32xbf16> to vector<16x8xbf16>
    "tpu.trace_start"() <{level = 10 : i32, message = "qd,kd->qk"}> : () -> ()
    %cst_62 = arith.constant dense<0.000000e+00> : vector<16x16xf32>
    %227 = tpu.matmul %225, %226, %cst_62 {dimension_numbers = #tpu.dot_dimension_numbers<[1], [1], [0], [0], [0, 0, 1, 0], [], []>} : vector<16x8xbf16>, vector<16x8xbf16>, vector<16x16xf32> -> vector<16x16xf32>
    "tpu.trace_stop"() : () -> ()
    %228 = arith.addf %227, %1 : vector<16x16xf32>
    %cst_63 = arith.constant dense<0xFF800000> : vector<16xf32>
    %229 = vector.multi_reduction <maximumf>, %228, %cst_63 [1] : vector<16x16xf32> to vector<16xf32>
    %230 = vector.shape_cast %229 : vector<16xf32> to vector<16x1xf32>
    %231 = vector.broadcast %230 : vector<16x1xf32> to vector<16x16xf32>
    %232 = arith.subf %228, %231 : vector<16x16xf32>
    %233 = math.exp %232 : vector<16x16xf32>
    %cst_64 = arith.constant dense<0.000000e+00> : vector<16xf32>
    %234 = vector.multi_reduction <add>, %233, %cst_64 [1] : vector<16x16xf32> to vector<16xf32>
    %235 = vector.shape_cast %234 : vector<16xf32> to vector<16x1xf32>
    %236 = tpu.reciprocal %235 {approx = true} : vector<16x1xf32> -> vector<16x1xf32>
    %237 = vector.broadcast %236 : vector<16x1xf32> to vector<16x16xf32>
    %238 = arith.mulf %233, %237 : vector<16x16xf32>
    %239 = arith.truncf %238 : vector<16x16xf32> to vector<16x16xbf16>
    %240 = vector.extract_strided_slice %223 {offsets = [0, 0], sizes = [16, 32], strides = [1, 1]} : vector<16x128xbf16> to vector<16x32xbf16>
    %cst_65 = arith.constant dense<0.000000e+00> : vector<16x32xf32>
    %241 = tpu.matmul %239, %240, %cst_65 {dimension_numbers = #tpu.dot_dimension_numbers<[1], [0], [0], [1], [0, 0, 1, 1], [], []>} : vector<16x16xbf16>, vector<16x32xbf16>, vector<16x32xf32> -> vector<16x32xf32>
    %242 = arith.addf %224, %241 : vector<16x32xf32>
    %243 = vector.extract_strided_slice %217 {offsets = [0, 8], sizes = [16, 8], strides = [1, 1]} : vector<16x32xbf16> to vector<16x8xbf16>
    %244 = vector.extract_strided_slice %221 {offsets = [0, 8], sizes = [16, 8], strides = [1, 1]} : vector<16x32xbf16> to vector<16x8xbf16>
    "tpu.trace_start"() <{level = 10 : i32, message = "qd,kd->qk"}> : () -> ()
    %cst_66 = arith.constant dense<0.000000e+00> : vector<16x16xf32>
    %245 = tpu.matmul %243, %244, %cst_66 {dimension_numbers = #tpu.dot_dimension_numbers<[1], [1], [0], [0], [0, 0, 1, 0], [], []>} : vector<16x8xbf16>, vector<16x8xbf16>, vector<16x16xf32> -> vector<16x16xf32>
    "tpu.trace_stop"() : () -> ()
    %246 = arith.addf %245, %1 : vector<16x16xf32>
    %cst_67 = arith.constant dense<0xFF800000> : vector<16xf32>
    %247 = vector.multi_reduction <maximumf>, %246, %cst_67 [1] : vector<16x16xf32> to vector<16xf32>
    %248 = vector.shape_cast %247 : vector<16xf32> to vector<16x1xf32>
    %249 = vector.broadcast %248 : vector<16x1xf32> to vector<16x16xf32>
    %250 = arith.subf %246, %249 : vector<16x16xf32>
    %251 = math.exp %250 : vector<16x16xf32>
    %cst_68 = arith.constant dense<0.000000e+00> : vector<16xf32>
    %252 = vector.multi_reduction <add>, %251, %cst_68 [1] : vector<16x16xf32> to vector<16xf32>
    %253 = vector.shape_cast %252 : vector<16xf32> to vector<16x1xf32>
    %254 = tpu.reciprocal %253 {approx = true} : vector<16x1xf32> -> vector<16x1xf32>
    %255 = vector.broadcast %254 : vector<16x1xf32> to vector<16x16xf32>
    %256 = arith.mulf %251, %255 : vector<16x16xf32>
    %257 = arith.truncf %256 : vector<16x16xf32> to vector<16x16xbf16>
    %258 = vector.extract_strided_slice %223 {offsets = [0, 32], sizes = [16, 32], strides = [1, 1]} : vector<16x128xbf16> to vector<16x32xbf16>
    %cst_69 = arith.constant dense<0.000000e+00> : vector<16x32xf32>
    %259 = tpu.matmul %257, %258, %cst_69 {dimension_numbers = #tpu.dot_dimension_numbers<[1], [0], [0], [1], [0, 0, 1, 1], [], []>} : vector<16x16xbf16>, vector<16x32xbf16>, vector<16x32xf32> -> vector<16x32xf32>
    %260 = arith.addf %242, %259 : vector<16x32xf32>
    %261 = vector.extract_strided_slice %217 {offsets = [0, 16], sizes = [16, 8], strides = [1, 1]} : vector<16x32xbf16> to vector<16x8xbf16>
    %262 = vector.extract_strided_slice %221 {offsets = [0, 16], sizes = [16, 8], strides = [1, 1]} : vector<16x32xbf16> to vector<16x8xbf16>
    "tpu.trace_start"() <{level = 10 : i32, message = "qd,kd->qk"}> : () -> ()
    %cst_70 = arith.constant dense<0.000000e+00> : vector<16x16xf32>
    %263 = tpu.matmul %261, %262, %cst_70 {dimension_numbers = #tpu.dot_dimension_numbers<[1], [1], [0], [0], [0, 0, 1, 0], [], []>} : vector<16x8xbf16>, vector<16x8xbf16>, vector<16x16xf32> -> vector<16x16xf32>
    "tpu.trace_stop"() : () -> ()
    %264 = arith.addf %263, %1 : vector<16x16xf32>
    %cst_71 = arith.constant dense<0xFF800000> : vector<16xf32>
    %265 = vector.multi_reduction <maximumf>, %264, %cst_71 [1] : vector<16x16xf32> to vector<16xf32>
    %266 = vector.shape_cast %265 : vector<16xf32> to vector<16x1xf32>
    %267 = vector.broadcast %266 : vector<16x1xf32> to vector<16x16xf32>
    %268 = arith.subf %264, %267 : vector<16x16xf32>
    %269 = math.exp %268 : vector<16x16xf32>
    %cst_72 = arith.constant dense<0.000000e+00> : vector<16xf32>
    %270 = vector.multi_reduction <add>, %269, %cst_72 [1] : vector<16x16xf32> to vector<16xf32>
    %271 = vector.shape_cast %270 : vector<16xf32> to vector<16x1xf32>
    %272 = tpu.reciprocal %271 {approx = true} : vector<16x1xf32> -> vector<16x1xf32>
    %273 = vector.broadcast %272 : vector<16x1xf32> to vector<16x16xf32>
    %274 = arith.mulf %269, %273 : vector<16x16xf32>
    %275 = arith.truncf %274 : vector<16x16xf32> to vector<16x16xbf16>
    %276 = vector.extract_strided_slice %223 {offsets = [0, 64], sizes = [16, 32], strides = [1, 1]} : vector<16x128xbf16> to vector<16x32xbf16>
    %cst_73 = arith.constant dense<0.000000e+00> : vector<16x32xf32>
    %277 = tpu.matmul %275, %276, %cst_73 {dimension_numbers = #tpu.dot_dimension_numbers<[1], [0], [0], [1], [0, 0, 1, 1], [], []>} : vector<16x16xbf16>, vector<16x32xbf16>, vector<16x32xf32> -> vector<16x32xf32>
    %278 = arith.addf %260, %277 : vector<16x32xf32>
    %279 = vector.extract_strided_slice %217 {offsets = [0, 24], sizes = [16, 8], strides = [1, 1]} : vector<16x32xbf16> to vector<16x8xbf16>
    %280 = vector.extract_strided_slice %221 {offsets = [0, 24], sizes = [16, 8], strides = [1, 1]} : vector<16x32xbf16> to vector<16x8xbf16>
    "tpu.trace_start"() <{level = 10 : i32, message = "qd,kd->qk"}> : () -> ()
    %cst_74 = arith.constant dense<0.000000e+00> : vector<16x16xf32>
    %281 = tpu.matmul %279, %280, %cst_74 {dimension_numbers = #tpu.dot_dimension_numbers<[1], [1], [0], [0], [0, 0, 1, 0], [], []>} : vector<16x8xbf16>, vector<16x8xbf16>, vector<16x16xf32> -> vector<16x16xf32>
    "tpu.trace_stop"() : () -> ()
    %282 = arith.addf %281, %1 : vector<16x16xf32>
    %cst_75 = arith.constant dense<0xFF800000> : vector<16xf32>
    %283 = vector.multi_reduction <maximumf>, %282, %cst_75 [1] : vector<16x16xf32> to vector<16xf32>
    %284 = vector.shape_cast %283 : vector<16xf32> to vector<16x1xf32>
    %285 = vector.broadcast %284 : vector<16x1xf32> to vector<16x16xf32>
    %286 = arith.subf %282, %285 : vector<16x16xf32>
    %287 = math.exp %286 : vector<16x16xf32>
    %cst_76 = arith.constant dense<0.000000e+00> : vector<16xf32>
    %288 = vector.multi_reduction <add>, %287, %cst_76 [1] : vector<16x16xf32> to vector<16xf32>
    %289 = vector.shape_cast %288 : vector<16xf32> to vector<16x1xf32>
    %290 = tpu.reciprocal %289 {approx = true} : vector<16x1xf32> -> vector<16x1xf32>
    %291 = vector.broadcast %290 : vector<16x1xf32> to vector<16x16xf32>
    %292 = arith.mulf %287, %291 : vector<16x16xf32>
    %293 = arith.truncf %292 : vector<16x16xf32> to vector<16x16xbf16>
    %294 = vector.extract_strided_slice %223 {offsets = [0, 96], sizes = [16, 32], strides = [1, 1]} : vector<16x128xbf16> to vector<16x32xbf16>
    %cst_77 = arith.constant dense<0.000000e+00> : vector<16x32xf32>
    %295 = tpu.matmul %293, %294, %cst_77 {dimension_numbers = #tpu.dot_dimension_numbers<[1], [0], [0], [1], [0, 0, 1, 1], [], []>} : vector<16x16xbf16>, vector<16x32xbf16>, vector<16x32xf32> -> vector<16x32xf32>
    %296 = arith.addf %278, %295 : vector<16x32xf32>
    %297 = arith.addf %174, %296 : vector<16x32xf32>
    %298 = vector.broadcast %181 : vector<1x32xf32> to vector<16x32xf32>
    %299 = arith.addf %297, %298 : vector<16x32xf32>
    %cst_78 = arith.constant dense<0.000000e+00> : vector<16xf32>
    %300 = vector.multi_reduction <add>, %299, %cst_78 [1] : vector<16x32xf32> to vector<16xf32>
    %301 = vector.shape_cast %300 : vector<16xf32> to vector<16x1xf32>
    %cst_79 = arith.constant 3.200000e+01 : f32
    %302 = vector.broadcast %cst_79 : f32 to vector<16x1xf32>
    %303 = arith.divf %301, %302 : vector<16x1xf32>
    %304 = vector.broadcast %303 : vector<16x1xf32> to vector<16x32xf32>
    %305 = arith.subf %299, %304 : vector<16x32xf32>
    %306 = arith.mulf %305, %305 : vector<16x32xf32>
    %cst_80 = arith.constant dense<0.000000e+00> : vector<16xf32>
    %307 = vector.multi_reduction <add>, %306, %cst_80 [1] : vector<16x32xf32> to vector<16xf32>
    %308 = vector.shape_cast %307 : vector<16xf32> to vector<16x1xf32>
    %cst_81 = arith.constant 3.200000e+01 : f32
    %309 = vector.broadcast %cst_81 : f32 to vector<16x1xf32>
    %310 = arith.divf %308, %309 : vector<16x1xf32>
    %311 = vector.broadcast %303 : vector<16x1xf32> to vector<16x32xf32>
    %312 = arith.subf %299, %311 : vector<16x32xf32>
    %cst_82 = arith.constant 9.99999974E-6 : f32
    %313 = vector.broadcast %cst_82 : f32 to vector<16x1xf32>
    %314 = arith.addf %310, %313 : vector<16x1xf32>
    %315 = math.rsqrt %314 : vector<16x1xf32>
    %316 = vector.broadcast %315 : vector<16x1xf32> to vector<16x32xf32>
    %317 = arith.mulf %312, %316 : vector<16x32xf32>
    %318 = vector.broadcast %179 : vector<1x32xf32> to vector<16x32xf32>
    %319 = arith.mulf %317, %318 : vector<16x32xf32>
    %320 = vector.broadcast %180 : vector<1x32xf32> to vector<16x32xf32>
    %321 = arith.addf %319, %320 : vector<16x32xf32>
    %322 = arith.truncf %321 : vector<16x32xf32> to vector<16x32xbf16>
    %c1_83 = arith.constant 1 : index
    %c0_84 = arith.constant 0 : index
    %c0_85 = arith.constant 0 : index
    %323 = vector.load %arg4[%c1_83, %c0_84, %c0_85] : memref<2x32x64xbf16, #tpu.memory_space<vmem>>, vector<1x32x64xbf16>
    %324 = vector.shape_cast %323 : vector<1x32x64xbf16> to vector<32x64xbf16>
    %cst_86 = arith.constant dense<0.000000e+00> : vector<16x64xf32>
    %325 = tpu.matmul %322, %324, %cst_86 {dimension_numbers = #tpu.dot_dimension_numbers<[1], [0], [0], [1], [0, 0, 1, 1], [], []>} : vector<16x32xbf16>, vector<32x64xbf16>, vector<16x64xf32> -> vector<16x64xf32>
    %326 = vector.broadcast %185 : vector<1x64xf32> to vector<16x64xf32>
    %327 = arith.addf %325, %326 : vector<16x64xf32>
    %328 = arith.mulf %327, %327 : vector<16x64xf32>
    %329 = arith.mulf %327, %328 : vector<16x64xf32>
    %cst_87 = arith.constant 4.471500e-02 : f32
    %330 = vector.broadcast %cst_87 : f32 to vector<16x64xf32>
    %331 = arith.mulf %330, %329 : vector<16x64xf32>
    %332 = arith.addf %327, %331 : vector<16x64xf32>
    %cst_88 = arith.constant 0.797884583 : f32
    %333 = vector.broadcast %cst_88 : f32 to vector<16x64xf32>
    %334 = arith.mulf %333, %332 : vector<16x64xf32>
    %335 = math.tanh %334 : vector<16x64xf32>
    %cst_89 = arith.constant 1.000000e+00 : f32
    %336 = vector.broadcast %cst_89 : f32 to vector<16x64xf32>
    %337 = arith.addf %336, %335 : vector<16x64xf32>
    %cst_90 = arith.constant 5.000000e-01 : f32
    %338 = vector.broadcast %cst_90 : f32 to vector<16x64xf32>
    %339 = arith.mulf %338, %337 : vector<16x64xf32>
    %340 = arith.mulf %327, %339 : vector<16x64xf32>
    %341 = arith.truncf %340 : vector<16x64xf32> to vector<16x64xbf16>
    %c1_91 = arith.constant 1 : index
    %c0_92 = arith.constant 0 : index
    %c0_93 = arith.constant 0 : index
    %342 = vector.load %arg5[%c1_91, %c0_92, %c0_93] : memref<2x64x32xbf16, #tpu.memory_space<vmem>>, vector<1x64x32xbf16>
    %343 = vector.shape_cast %342 : vector<1x64x32xbf16> to vector<64x32xbf16>
    %cst_94 = arith.constant dense<0.000000e+00> : vector<16x32xf32>
    %344 = tpu.matmul %341, %343, %cst_94 {dimension_numbers = #tpu.dot_dimension_numbers<[1], [0], [0], [1], [0, 0, 1, 1], [], []>} : vector<16x64xbf16>, vector<64x32xbf16>, vector<16x32xf32> -> vector<16x32xf32>
    %345 = arith.addf %299, %344 : vector<16x32xf32>
    %346 = vector.broadcast %182 : vector<1x32xf32> to vector<16x32xf32>
    %347 = arith.addf %345, %346 : vector<16x32xf32>
    %c0_95 = arith.constant 0 : index
    %c0_96 = arith.constant 0 : index
    %c0_97 = arith.constant 0 : index
    %348 = vector.load %arg6[%c0_95, %c0_96, %c0_97] : memref<2x8x128xf32, #tpu.memory_space<vmem>>, vector<1x8x128xf32>
    %349 = vector.shape_cast %348 : vector<1x8x128xf32> to vector<8x128xf32>
    %350 = vector.extract_strided_slice %349 {offsets = [6, 0], sizes = [1, 32], strides = [1, 1]} : vector<8x128xf32> to vector<1x32xf32>
    %351 = vector.extract_strided_slice %349 {offsets = [7, 0], sizes = [1, 32], strides = [1, 1]} : vector<8x128xf32> to vector<1x32xf32>
    %cst_98 = arith.constant dense<0.000000e+00> : vector<16xf32>
    %352 = vector.multi_reduction <add>, %347, %cst_98 [1] : vector<16x32xf32> to vector<16xf32>
    %353 = vector.shape_cast %352 : vector<16xf32> to vector<16x1xf32>
    %cst_99 = arith.constant 3.200000e+01 : f32
    %354 = vector.broadcast %cst_99 : f32 to vector<16x1xf32>
    %355 = arith.divf %353, %354 : vector<16x1xf32>
    %356 = vector.broadcast %355 : vector<16x1xf32> to vector<16x32xf32>
    %357 = arith.subf %347, %356 : vector<16x32xf32>
    %358 = arith.mulf %357, %357 : vector<16x32xf32>
    %cst_100 = arith.constant dense<0.000000e+00> : vector<16xf32>
    %359 = vector.multi_reduction <add>, %358, %cst_100 [1] : vector<16x32xf32> to vector<16xf32>
    %360 = vector.shape_cast %359 : vector<16xf32> to vector<16x1xf32>
    %cst_101 = arith.constant 3.200000e+01 : f32
    %361 = vector.broadcast %cst_101 : f32 to vector<16x1xf32>
    %362 = arith.divf %360, %361 : vector<16x1xf32>
    %363 = vector.broadcast %355 : vector<16x1xf32> to vector<16x32xf32>
    %364 = arith.subf %347, %363 : vector<16x32xf32>
    %cst_102 = arith.constant 9.99999974E-6 : f32
    %365 = vector.broadcast %cst_102 : f32 to vector<16x1xf32>
    %366 = arith.addf %362, %365 : vector<16x1xf32>
    %367 = math.rsqrt %366 : vector<16x1xf32>
    %368 = vector.broadcast %367 : vector<16x1xf32> to vector<16x32xf32>
    %369 = arith.mulf %364, %368 : vector<16x32xf32>
    %370 = vector.broadcast %350 : vector<1x32xf32> to vector<16x32xf32>
    %371 = arith.mulf %369, %370 : vector<16x32xf32>
    %372 = vector.broadcast %351 : vector<1x32xf32> to vector<16x32xf32>
    %373 = arith.addf %371, %372 : vector<16x32xf32>
    %c0_103 = arith.constant 0 : index
    %c0_104 = arith.constant 0 : index
    %374 = vector.load %arg7[%c0_103, %c0_104] : memref<16x32xf32, #tpu.memory_space<vmem>>, vector<16x32xf32>
    tpu.vector_store %arg7[%c0_103, %c0_104], %373 {strides = array<i32>} : memref<16x32xf32, #tpu.memory_space<vmem>>, vector<16x32xf32>,
    return
  }
  func.func @transform_0(%arg0: i32) -> (i32, i32) {
    %c0_i32 = arith.constant 0 : i32
    %c0_i32_0 = arith.constant 0 : i32
    %c0_i32_1 = arith.constant 0 : i32
    return %c0_i32, %c0_i32_0 : i32, i32
  }
  func.func @transform_1(%arg0: i32) -> (i32, i32) {
    %c0_i32 = arith.constant 0 : i32
    %c0_i32_0 = arith.constant 0 : i32
    %c0_i32_1 = arith.constant 0 : i32
    return %c0_i32, %c0_i32_0 : i32, i32
  }
  func.func @transform_2(%arg0: i32) -> (i32, i32, i32) {
    %c0_i32 = arith.constant 0 : i32
    %c0_i32_0 = arith.constant 0 : i32
    %c0_i32_1 = arith.constant 0 : i32
    %c0_i32_2 = arith.constant 0 : i32
    return %c0_i32, %c0_i32_0, %c0_i32_1 : i32, i32, i32
  }
  func.func @transform_3(%arg0: i32) -> (i32, i32, i32) {
    %c0_i32 = arith.constant 0 : i32
    %c0_i32_0 = arith.constant 0 : i32
    %c0_i32_1 = arith.constant 0 : i32
    %c0_i32_2 = arith.constant 0 : i32
    return %c0_i32, %c0_i32_0, %c0_i32_1 : i32, i32, i32
  }
  func.func @transform_4(%arg0: i32) -> (i32, i32, i32) {
    %c0_i32 = arith.constant 0 : i32
    %c0_i32_0 = arith.constant 0 : i32
    %c0_i32_1 = arith.constant 0 : i32
    %c0_i32_2 = arith.constant 0 : i32
    return %c0_i32, %c0_i32_0, %c0_i32_1 : i32, i32, i32
  }
  func.func @transform_5(%arg0: i32) -> (i32, i32, i32) {
    %c0_i32 = arith.constant 0 : i32
    %c0_i32_0 = arith.constant 0 : i32
    %c0_i32_1 = arith.constant 0 : i32
    %c0_i32_2 = arith.constant 0 : i32
    return %c0_i32, %c0_i32_0, %c0_i32_1 : i32, i32, i32
  }
  func.func @transform_6(%arg0: i32) -> (i32, i32) {
    %c0_i32 = arith.constant 0 : i32
    %c0_i32_0 = arith.constant 0 : i32
    %c0_i32_1 = arith.constant 0 : i32
    return %c0_i32, %c0_i32_0 : i32, i32
  }
}

</mosaic_0001>

<bundles_post_ra>
// kernel: tpu_custom_call.1
= control target key start
LH: loop header
LB: loop body
LE: loop exit
PB: predicated region body
PF: predicated region fallthrough
CT: control target
= control target key end

     0   :  { %11 = vsyncpa [#allocation3], 0  ;;  %s2717_s0 = inlined_call_operand.hbm [shape: f32[16,32], index: 0, kind: input, shape index: {}]   ;;  %s2718_s1 = inlined_call_operand.hbm [shape: f32[16,16], index: 1, kind: input, shape index: {}]   ;;  %s2719_s2 = inlined_call_operand.vmem [shape: bf16[2,32,192], index: 2, kind: input, shape index: {}]   ;;  %s2720_s3 = inlined_call_operand.vmem [shape: bf16[2,32,64], index: 3, kind: input, shape index: {}]   ;;  %s2721_s4 = inlined_call_operand.vmem [shape: bf16[2,64,32], index: 4, kind: input, shape index: {}]   ;;  %s2722_s5 = inlined_call_operand.hbm [shape: f32[2,8,128], index: 5, kind: input, shape index: {}]   ;;  %s2723_s6 = inlined_call_operand.hbm [shape: f32[16,32], index: 6, kind: output, shape index: {}]  }
   0x1   :  { %12 = vsyncpa [#allocation6], 0 }
   0x2   :  { %13 = vsyncpa [#allocation4], 0  ;;  %s2248_s21 = smov [#allocation5]   ;;  %s2249_s23 = smov [#allocation2]  }
   0x3   :  { %s31_s22 = sshll.u32 %s2248_s21, 4  ;;  %s19_s24 = sshll.u32 %s2249_s23, 4  ;;  %s32_s22 = int_to_ptr.vmem [resolvable:$true] %s31_s22  ;;  %s20_s24 = int_to_ptr.vmem [resolvable:$true] %s19_s24 }
   0x4   :  { %s2170_s25 = scalar_lea.vmem %s32_s22, 256  ;;  %p2175_p1 = scmp.lt.s32.totalorder %s32_s22, %s32_s22 }
   0x5   :  { %p2171_p0 = scmp.ne.s32.totalorder %s32_s22, %s2170_s25  ;;  %p2176_p2 = scmp.lt.s32.totalorder %s2170_s25, %s2170_s25 }
   0x7   :  { %p2177_p3 = por %p2176_p2, %p2175_p1 }
   0x9   :  { %p2178_p4 = pnand %p2177_p3, %p2171_p0 }
   0xb   :  { %2181 = shalt.err (!%p2178_p4)
}
   0xc   :  { %s2250_s26 = smov 128   ;;  %s2251_s27 = smov 8  }
   0xd   :  { %37 = dma.hbm_to_vmem [thread:$0]  %s2718_s1, 256, %s32_s22, [#allocation6], %s2250_s26, %s2250_s26, %s2251_s27  }
   0xe   :  { %s2190_s30 = scalar_lea.vmem %s20_s24, 256  ;;  %p2195_p6 = scmp.lt.s32.totalorder %s20_s24, %s20_s24 }
   0xf   :  { %p2191_p5 = scmp.ne.s32.totalorder %s20_s24, %s2190_s30  ;;  %p2196_p7 = scmp.lt.s32.totalorder %s2190_s30, %s2190_s30 }
  0x11   :  { %p2197_p8 = por %p2196_p7, %p2195_p6 }
  0x13   :  { %p2198_p9 = pnand %p2197_p8, %p2191_p5 }
  0x15   :  { %2201 = shalt.err (!%p2198_p9)
}
  0x16   :  { %25 = dma.hbm_to_vmem [thread:$0]  %s2717_s0, 256, %s20_s24, [#allocation3], %s2250_s26, %s2250_s26, %s2251_s27  }
  0x17   :  { %s2252_s9 = smov [#allocation7]  }
  0x18   :  { %s49_s10 = sshll.u32 %s2252_s9, 4  ;;  %s50_s10 = int_to_ptr.vmem [resolvable:$true] %s49_s10 }
  0x19   :  { %s2210_s11 = scalar_lea.vmem %s50_s10, 256  ;;  %p2215_p11 = scmp.lt.s32.totalorder %s50_s10, %s50_s10 }
  0x1a   :  { %p2211_p10 = scmp.ne.s32.totalorder %s50_s10, %s2210_s11  ;;  %p2216_p12 = scmp.lt.s32.totalorder %s2210_s11, %s2210_s11 }
  0x1c   :  { %p2217_p13 = por %p2216_p12, %p2215_p11 }
  0x1e   :  { %p2218_p0 = pnand %p2217_p13, %p2211_p10 }
  0x20   :  { %2221 = shalt.err (!%p2218_p0)
}
  0x21   :  { %55 = dma.hbm_to_vmem [thread:$0]  %s2722_s5, 256, %s50_s10, [#allocation6], %s2250_s26, %s2250_s26, %s2251_s27  }
  0x22   :  { %2242 = dma.done.wait [#allocation3], 256  }
  0x23   :  { %2243 = vsyncadd [#allocation3], 4294967040 }
  0x24   :  { %2244 = dma.done.wait [#allocation6], 512  }
  0x25   :  { %2245 = vsyncadd [#allocation6], 4294966784  ;;  %vm71_vm0 = vcmask 261120   ;;  %v2319_v0 = vld [vmem:[#allocation2] sm:$0xff]  ;;  %v2321_v1 = vld [vmem:[#allocation2 + $0x8] sm:$0xff]  ;;  %v2253_v17 = vmov 0   ;;  %v99_v19 = vlaneseq }
  0x26   :  { %v72_v2 = vsel %vm71_vm0, %v2319_v0, 0.0  ;;  %v75_v3 = vsel %vm71_vm0, %v2321_v1, 0.0  ;;  %v2046_v14 = vld [vmem:[%s2719_s2 + $0x14] ss:$8 sps:$4 sm:$0xff]   ;;  %v2048_v15 = vld [vmem:[%s2719_s2 + $0x10] ss:$8 sps:$4 sm:$0xff]   ;;  %171 = vmatprep.mubr.bf16.mxu1 %v2253_v17 }
  0x27   :  { %73 = vadd.xlane.f32.xlu0 %v72_v2  ;;  %v2049_v16 = vld [vmem:[%s2719_s2 + $0x4] ss:$8 sps:$4 sm:$0xff]   ;;  %151 = vmatprep.subr.bf16.mxu1 %v2046_v14  ;;  %v2051_v18 = vld [vmem:[%s2719_s2] ss:$8 sps:$4 sm:$0xff]   ;;  %v2344_v20 = vshrl.u32 %v99_v19, 7  ;;  %s2254_s19 = smov 96  }
  0x28   :  { %152 = vmatpush1.bf16.msra.mxu1 %v2048_v15  ;;  %v2347_v22 = vld [vmem:[#allocation7] sm:$0xff]  ;;  %v2255_v41 = vmov 0.0   ;;  %vm2256_vm1 = vmmov 0   ;;  %s2257_s20 = smov 88   ;;  %s2258_s21 = smov 120   ;;  %vm199_vm2 = vcmask 64512  }
  0x29   :  { %153 = vmatprep.subr.bf16.mxu1 %v2049_v16  ;;  %v101_v21 = vsub.s32 0, %v2344_v20  ;;  %v107_v32 = vsub.s32 1, %v2344_v20  ;;  %1898 = vmatprep.subr.bf16.mxu0 %v2255_v41  ;;  %v2380_v58 = vld [vmem:[#allocation5] sm:$0xff]  ;;  %vm247_vm3 = vcmask 130048   ;;  %v2383_v62 = vld [vmem:[#allocation5 + $0x8] sm:$0xff]  ;;  %s2259_s22 = smov 80  }
  0x2a   :  { %1900 = vmatprep.mubr.msk.bf16.mxu0 %vm2256_vm1, %v2255_v41  ;;  %s2260_s23 = smov 112   ;;  %s2261_s24 = smov 72   ;;  %vm846_vm4 = vcmask 523264  }
  0x2b   :  { %76 = vadd.xlane.f32.xlu0 %v75_v3  ;;  %v2352_v23 = vrot.slane %v2347_v22, %v101_v21  ;;  %v108_v36 = vrot.slane %v2347_v22, %v107_v32  ;;  %s2262_s25 = smov 32   ;;  %s2263_s28 = smov 104  }
  0x2c   :  { %154 = vmatpush1.bf16.msra.mxu1 %v2051_v18  ;;  %s2264_s29 = smov 64  }
  0x2d   :  { %1892 = vmatprep.subr.bf16.mxu1 %v2255_v41 }
  0x41   :  { %183 = vrot.lane.b32.xlu0 %v2352_v23, %s2254_s19 }
  0xb0   :  { %v74_v4 = vpop.xlane.xlu0 %73 }
  0xb1   :  { %v79_v5 = vmul.f32 0.03125, %v74_v4 }
  0xb3   :  { %v81_v6 = vsub.f32 %v2319_v0, %v79_v5 }
  0xb4   :  { %v77_v7 = vpop.xlane.xlu0 %76 }
  0xb5   :  { %v80_v8 = vmul.f32 0.03125, %v77_v7  ;;  %v83_v9 = vmul.f32 %v81_v6, %v81_v6 }
  0xb7   :  { %v82_v10 = vsub.f32 %v2321_v1, %v80_v8  ;;  %v85_v11 = vsel %vm71_vm0, %v83_v9, 0.0 }
  0xb8   :  { %86 = vadd.xlane.f32.xlu1 %v85_v11  ;;  %v184_v43 = vpop.permute.xlu0 %183 }
  0xb9   :  { %v84_v12 = vmul.f32 %v82_v10, %v82_v10 }
  0xbb   :  { %v88_v13 = vsel %vm71_vm0, %v84_v12, 0.0 }
  0xbc   :  { %89 = vadd.xlane.f32.xlu1 %v88_v13 }
 0x141   :  { %v87_v24 = vpop.xlane.xlu1 %86 }
 0x142   :  { %v91_v25 = vmul.f32 0.03125, %v87_v24 }
 0x144   :  { %v93_v26 = vadd.f32 1e-05, %v91_v25 }
 0x145   :  { %v90_v27 = vpop.xlane.xlu1 %89 }
 0x146   :  { %2070 = vrsqrt.f32 %v93_v26  ;;  %v92_v28 = vmul.f32 0.03125, %v90_v27 }
 0x148   :  { %v94_v29 = vadd.f32 1e-05, %v92_v28 }
 0x14a   :  { %2072 = vrsqrt.f32 %v94_v29 }
 0x153   :  { %v2071_v30 = vpop.eup %2070 }
 0x154   :  { %v97_v31 = vmul.f32 %v2071_v30, %v81_v6 }
 0x156   :  { %v103_v35 = vmul.f32 %v2352_v23, %v97_v31 }
 0x157   :  { %v2073_v33 = vpop.eup %2072 }
 0x158   :  { %v98_v34 = vmul.f32 %v2073_v33, %v82_v10  ;;  %v109_v38 = vadd.f32 %v108_v36, %v103_v35 }
 0x15a   :  { %v104_v37 = vmul.f32 %v2352_v23, %v98_v34 }
 0x15c   :  { %v110_v39 = vadd.f32 %v108_v36, %v104_v37 }
 0x15e   :  { %v111_v40 = vpack.c.bf16 %v110_v39, %v109_v38 }
 0x160   :  { %1790 = vmatmul.mubr.msk.bf16.vlgmr.msra.gmra.mxu1 %vm71_vm0, %v111_v40 }
 0x161   :  { %1894 = vmatprep.mubr.msk.bf16.mxu1 %vm2256_vm1, %v2255_v41 }
 0x220   :  { %v173_v42 = vpop.f32.mrf.mxu1 }
 0x221   :  { %v191_v45 = vadd.f32 %v173_v42, %v108_v36  ;;  %v186_v47 = vadd.f32 %v184_v43, %v173_v42 }
 0x222   :  { %v2369_v44 = vpop.f32.mrf.mxu1 }
 0x223   :  { %v188_v53 = vmul.f32 0.35355338, %v186_v47 }
 0x224   :  { %v177_v46 = vpop.f32.mrf.mxu1 }
 0x225   :  { %v187_v48 = vadd.f32 %v184_v43, %v177_v46  ;;  %v192_v49 = vadd.f32 %v177_v46, %v108_v36  ;;  %v2371_v50 = vpack.c.bf16 %v177_v46, %v173_v42 }
 0x226   :  { %v2416_v38 = vpop.f32.mrf.mxu1 }
 0x227   :  { %v189_v51 = vmul.f32 0.35355338, %v187_v48  ;;  %v193_v52 = vpack.c.bf16 %v192_v49, %v191_v45 }
 0x229   :  { %274 = vrot.lane.b32.xlu1 %v193_v52, %s2257_s20  ;;  %v190_v54 = vpack.c.bf16 %v189_v51, %v188_v53 }
 0x22d   :  { %272 = vrot.lane.b32.xlu1 %v190_v54, %s2258_s21 }
 0x29b   :  { %v275_v55 = vpop.permute.xlu1 %274 }
 0x29c   :  { %v280_v56 = vsel %vm199_vm2, %v275_v55, 0 }
 0x29d   :  { %1899 = vmatpush3.bf16.xpose.msra.mxu0 %v280_v56 }
 0x29e   :  { %1910 = vmatprep.subr.bf16.mxu0 %v2255_v41 }
 0x29f   :  { %v273_v57 = vpop.permute.xlu1 %272 }
 0x2a4   :  { %1901 = vmatmul.mubr.msk.bf16.vlgmr.msra.gmra.mxu0 %vm199_vm2, %v273_v57 }
 0x2a5   :  { %1912 = vmatprep.mubr.msk.bf16.mxu0 %vm2256_vm1, %v2255_v41 }
 0x364   :  { %v316_v59 = vpop.f32.mrf.mxu0 }
 0x365   :  { %v317_v60 = vadd.f32 %v316_v59, %v2380_v58 }
 0x366   :  { %v1902_v61 = vpop.f32.mrf.mxu0 }
 0x367   :  { %v323_v63 = vsel %vm247_vm3, %v317_v60, -inf }
 0x368   :  { %324 = vmax.xlane.f32.xlu1 %v323_v63  ;;  %v319_v2 = vpop.f32.mrf.mxu0 }
 0x369   :  { %v320_v3 = vadd.f32 %v319_v2, %v2383_v62 }
 0x36a   :  { %v1903_v4 = vpop.f32.mrf.mxu0 }
 0x36b   :  { %v326_v5 = vsel %vm247_vm3, %v320_v3, -inf }
 0x36c   :  { %327 = vmax.xlane.f32.xlu0 %v326_v5 }
 0x379   :  { %197 = vrot.lane.b32.xlu1 %v193_v52, %s2254_s19 }
 0x37d   :  { %443 = vrot.lane.b32.xlu1 %v193_v52, %s2259_s22 }
 0x381   :  { %441 = vrot.lane.b32.xlu1 %v190_v54, %s2260_s23 }
 0x385   :  { %563 = vrot.lane.b32.xlu1 %v193_v52, %s2261_s24 }
 0x3f1   :  { %v325_v6 = vpop.xlane.xlu1 %324 }
 0x3f2   :  { %v329_v7 = vsub.f32 %v317_v60, %v325_v6 }
 0x3f4   :  { %v331_v8 = vmul.f32 1.442695, %v329_v7 }
 0x3f5   :  { %v198_v9 = vpop.permute.xlu1 %197  ;;  %v328_v10 = vpop.xlane.xlu0 %327 }
 0x3f6   :  { %2074 = vpow2.f32 %v331_v8  ;;  %v204_v11 = vsel %vm199_vm2, %v198_v9, 0  ;;  %v330_v12 = vsub.f32 %v320_v3, %v328_v10 }
 0x3f7   :  { %1893 = vmatpush3.bf16.xpose.msra.mxu1 %v204_v11 }
 0x3f8   :  { %v333_v13 = vmul.f32 1.442695, %v330_v12  ;;  %1904 = vmatprep.subr.bf16.mxu1 %v2255_v41 }
 0x3f9   :  { %v444_v27 = vpop.permute.xlu1 %443 }
 0x3fa   :  { %2076 = vpow2.f32 %v333_v13  ;;  %v449_v34 = vsel %vm199_vm2, %v444_v27, 0 }
 0x3fd   :  { %v442_v33 = vpop.permute.xlu1 %441 }
 0x3fe   :  { %1895 = vmatmul.mubr.msk.bf16.vlgmr.msra.gmra.mxu1 %vm199_vm2, %v190_v54 }
 0x3ff   :  { %1906 = vmatprep.mubr.msk.bf16.mxu1 %vm2256_vm1, %v2255_v41 }
 0x401   :  { %v564_v35 = vpop.permute.xlu1 %563 }
 0x402   :  { %v569_v36 = vsel %vm199_vm2, %v564_v35, 0 }
 0x403   :  { %v2075_v14 = vpop.eup %2074 }
 0x404   :  { %v335_v15 = vsel %vm247_vm3, %v2075_v14, 0.0 }
 0x405   :  { %336 = vadd.xlane.f32.xlu0 %v335_v15 }
 0x407   :  { %v2077_v16 = vpop.eup %2076 }
 0x408   :  { %v338_v18 = vsel %vm247_vm3, %v2077_v16, 0.0 }
 0x409   :  { %339 = vadd.xlane.f32.xlu0 %v338_v18 }
 0x41f   :  { %347 = vrot.lane.b32.xlu0 %v2371_v50, %s2262_s25 }
 0x423   :  { %561 = vrot.lane.b32.xlu0 %v190_v54, %s2263_s28 }
 0x48e   :  { %v337_v19 = vpop.xlane.xlu0 %336 }
 0x48f   :  { %2078 = vrcp.f32 %v337_v19 }
 0x492   :  { %v340_v24 = vpop.xlane.xlu0 %339 }
 0x493   :  { %2080 = vrcp.f32 %v340_v24 }
 0x496   :  { %v348_v25 = vpop.permute.xlu0 %347 }
 0x497   :  { %1905 = vmatpush3.bf16.msra.mxu1 %v348_v25 }
 0x498   :  { %1916 = vmatprep.subr.bf16.mxu1 %v2255_v41 }
 0x49a   :  { %v562_v37 = vpop.permute.xlu0 %561 }
 0x49c   :  { %v2079_v26 = vpop.eup %2078 }
 0x49d   :  { %v343_v29 = vmul.f32 %v2079_v26, %v2075_v14 }
 0x4a0   :  { %v2081_v28 = vpop.eup %2080 }
 0x4a1   :  { %v344_v30 = vmul.f32 %v2081_v28, %v2077_v16 }
 0x4a3   :  { %v345_v31 = vpack.c.bf16 %v344_v30, %v343_v29 }
 0x4a5   :  { %1907 = vmatmul.mubr.msk.bf16.vlgmr.msra.gmra.mxu1 %vm247_vm3, %v345_v31 }
 0x4a6   :  { %1917 = vmatpush3.bf16.xpose.msra.mxu1 %v449_v34  ;;  %1918 = vmatprep.mubr.msk.bf16.mxu1 %vm2256_vm1, %v2255_v41 }
 0x4a7   :  { %1928 = vmatprep.subr.bf16.mxu1 %v2255_v41 }
 0x4ad   :  { %1919 = vmatmul.mubr.msk.bf16.vlgmr.msra.gmra.mxu1 %vm199_vm2, %v442_v33 }
 0x4ae   :  { %1929 = vmatpush3.bf16.xpose.msra.mxu1 %v569_v36  ;;  %1930 = vmatprep.mubr.msk.bf16.mxu1 %vm2256_vm1, %v2255_v41 }
 0x4af   :  { %1940 = vmatprep.subr.bf16.mxu1 %v2255_v41 }
 0x4b5   :  { %1931 = vmatmul.mubr.msk.bf16.vlgmr.msra.gmra.mxu1 %vm199_vm2, %v562_v37 }
 0x4b6   :  { %1944 = vmatprep.mubr.msk.bf16.mxu1 %vm2256_vm1, %v2255_v41 }
 0x4be   :  { %v240_v39 = vpop.f32.mrf.mxu1 }
 0x4bf   :  { %v241_v40 = vadd.f32 %v240_v39, %v2380_v58 }
 0x4c0   :  { %v1896_v42 = vpop.f32.mrf.mxu1 }
 0x4c1   :  { %v248_v43 = vsel %vm247_vm3, %v241_v40, -inf }
 0x4c2   :  { %249 = vmax.xlane.f32.xlu1 %v248_v43  ;;  %v243_v45 = vpop.f32.mrf.mxu1 }
 0x4c3   :  { %v244_v46 = vadd.f32 %v243_v45, %v2383_v62 }
 0x4c4   :  { %v1897_v47 = vpop.f32.mrf.mxu1 }
 0x4c5   :  { %v251_v48 = vsel %vm247_vm3, %v244_v46, -inf }
 0x4c6   :  { %252 = vmax.xlane.f32.xlu0 %v251_v48 }
 0x54b   :  { %v250_v49 = vpop.xlane.xlu1 %249 }
 0x54c   :  { %v254_v51 = vsub.f32 %v241_v40, %v250_v49  ;;  %v195_v49 = vpack.c.bf16 %v2416_v38, %v2369_v44 }
 0x54e   :  { %v256_v55 = vmul.f32 1.442695, %v254_v51 }
 0x54f   :  { %v253_v52 = vpop.xlane.xlu0 %252 }
 0x550   :  { %v255_v56 = vsub.f32 %v244_v46, %v253_v52  ;;  %2082 = vpow2.f32 %v256_v55 }
 0x552   :  { %v258_v60 = vmul.f32 1.442695, %v255_v56 }
 0x554   :  { %2084 = vpow2.f32 %v258_v60 }
 0x55d   :  { %v2083_v12 = vpop.eup %2082 }
 0x55e   :  { %v260_v16 = vsel %vm247_vm3, %v2083_v12, 0.0 }
 0x561   :  { %v2085_v19 = vpop.eup %2084 }
 0x562   :  { %v263_v24 = vsel %vm247_vm3, %v2085_v19, 0.0 }
 0x565   :  { %v2422_v53 = vpop.f32.mrf.mxu1 }
 0x567   :  { %v1908_v54 = vpop.f32.mrf.mxu1 }
 0x569   :  { %v2424_v57 = vpop.f32.mrf.mxu1 }
 0x56b   :  { %v1909_v59 = vpop.f32.mrf.mxu1 }
 0x56d   :  { %v485_v61 = vpop.f32.mrf.mxu1 }
 0x56e   :  { %v486_v63 = vadd.f32 %v485_v61, %v2380_v58 }
 0x56f   :  { %v1920_v2 = vpop.f32.mrf.mxu1 }
 0x570   :  { %v492_v3 = vsel %vm247_vm3, %v486_v63, -inf }
 0x571   :  { %493 = vmax.xlane.f32.xlu0 %v492_v3  ;;  %v488_v4 = vpop.f32.mrf.mxu1 }
 0x572   :  { %v489_v5 = vadd.f32 %v488_v4, %v2383_v62 }
 0x573   :  { %v1921_v6 = vpop.f32.mrf.mxu1 }
 0x574   :  { %v495_v7 = vsel %vm247_vm3, %v489_v5, -inf }
 0x575   :  { %496 = vmax.xlane.f32.xlu0 %v495_v7  ;;  %v605_v8 = vpop.f32.mrf.mxu1 }
 0x576   :  { %v606_v9 = vadd.f32 %v605_v8, %v2380_v58 }
 0x577   :  { %v1932_v10 = vpop.f32.mrf.mxu1 }
 0x578   :  { %v612_v11 = vsel %vm247_vm3, %v606_v9, -inf }
 0x579   :  { %613 = vmax.xlane.f32.xlu1 %v612_v11  ;;  %v608_v13 = vpop.f32.mrf.mxu1 }
 0x57a   :  { %v609_v14 = vadd.f32 %v608_v13, %v2383_v62 }
 0x57b   :  { %v1933_v15 = vpop.f32.mrf.mxu1 }
 0x57c   :  { %v615_v18 = vsel %vm247_vm3, %v609_v14, -inf }
 0x57d   :  { %261 = vadd.xlane.f32.xlu1 %v260_v16  ;;  %616 = vmax.xlane.f32.xlu0 %v615_v18 }
 0x581   :  { %264 = vadd.xlane.f32.xlu0 %v263_v24 }
 0x5fa   :  { %v494_v25 = vpop.xlane.xlu0 %493 }
 0x5fb   :  { %v498_v26 = vsub.f32 %v486_v63, %v494_v25 }
 0x5fd   :  { %v500_v27 = vmul.f32 1.442695, %v498_v26  ;;  %v689_v26 = vsub.s32 4, %v2344_v20 }
 0x5fe   :  { %v497_v28 = vpop.xlane.xlu0 %496 }
 0x5ff   :  { %2086 = vpow2.f32 %v500_v27  ;;  %v499_v29 = vsub.f32 %v489_v5, %v497_v28 }
 0x601   :  { %v502_v30 = vmul.f32 1.442695, %v499_v29 }
 0x602   :  { %v614_v31 = vpop.xlane.xlu1 %613 }
 0x603   :  { %2088 = vpow2.f32 %v502_v30  ;;  %v618_v33 = vsub.f32 %v606_v9, %v614_v31 }
 0x605   :  { %v620_v34 = vmul.f32 1.442695, %v618_v33  ;;  %v690_v33 = vrot.slane %v2347_v22, %v689_v26 }
 0x606   :  { %v617_v35 = vpop.xlane.xlu0 %616  ;;  %v262_v52 = vpop.xlane.xlu1 %261 }
 0x607   :  { %2090 = vpow2.f32 %v620_v34  ;;  %v619_v36 = vsub.f32 %v609_v14, %v617_v35 }
 0x609   :  { %v622_v37 = vmul.f32 1.442695, %v619_v36 }
 0x60a   :  { %v265_v51 = vpop.xlane.xlu0 %264 }
 0x60b   :  { %2092 = vpow2.f32 %v622_v37 }
 0x60c   :  { %v2087_v39 = vpop.eup %2086  ;;  %2094 = vrcp.f32 %v265_v51 }
 0x60d   :  { %v504_v40 = vsel %vm247_vm3, %v2087_v39, 0.0  ;;  %2096 = vrcp.f32 %v262_v52 }
 0x60e   :  { %505 = vadd.xlane.f32.xlu1 %v504_v40 }
 0x610   :  { %v2089_v42 = vpop.eup %2088 }
 0x611   :  { %v507_v43 = vsel %vm247_vm3, %v2089_v42, 0.0 }
 0x612   :  { %508 = vadd.xlane.f32.xlu0 %v507_v43 }
 0x614   :  { %v2091_v45 = vpop.eup %2090 }
 0x615   :  { %v624_v46 = vsel %vm247_vm3, %v2091_v45, 0.0 }
 0x616   :  { %625 = vadd.xlane.f32.xlu1 %v624_v46 }
 0x618   :  { %v2093_v47 = vpop.eup %2092 }
 0x619   :  { %v627_v48 = vsel %vm247_vm3, %v2093_v47, 0.0  ;;  %v2095_v56 = vpop.eup %2094 }
 0x61a   :  { %628 = vadd.xlane.f32.xlu0 %v627_v48  ;;  %v2097_v60 = vpop.eup %2096  ;;  %v269_v61 = vmul.f32 %v2095_v56, %v2085_v19  ;;  %v2477_v56 = vld [vmem:[#allocation7 + $0x8] sm:$0xff] }
 0x61b   :  { %v268_v2 = vmul.f32 %v2097_v60, %v2083_v12  ;;  %v2052_v60 = vld [vmem:[%s2720_s3 + $0x8] sm:$0xff]  }
 0x61c   :  { %1941 = vmatpush3.bf16.msra.mxu1 %v2052_v60 }
 0x61d   :  { %v270_v44 = vpack.c.bf16 %v269_v61, %v268_v2  ;;  %v2053_v61 = vld [vmem:[%s2720_s3] sm:$0xff]   ;;  %1942 = vmatprep.subr.bf16.mxu1 %v2255_v41 }
 0x620   :  { %1943 = vmatpush3.bf16.msra.mxu1 %v2053_v61 }
 0x627   :  { %394 = vrot.lane.b32.xlu1 %v2371_v50, %s2264_s29 }
 0x630   :  { %636 = vrot.lane.b32.xlu0 %v195_v49, %s2254_s19 }
 0x697   :  { %v506_v54 = vpop.xlane.xlu1 %505 }
 0x698   :  { %2098 = vrcp.f32 %v506_v54 }
 0x69b   :  { %v509_v55 = vpop.xlane.xlu0 %508 }
 0x69c   :  { %2100 = vrcp.f32 %v509_v55 }
 0x69f   :  { %v626_v59 = vpop.xlane.xlu1 %625 }
 0x6a0   :  { %2102 = vrcp.f32 %v626_v59  ;;  %v2484_v59 = vrot.slane %v2477_v56, %v101_v21 }
 0x6a3   :  { %v395_v63 = vpop.permute.xlu1 %394  ;;  %v629_v50 = vpop.xlane.xlu0 %628 }
 0x6a4   :  { %2104 = vrcp.f32 %v629_v50  ;;  %1911 = vmatpush3.bf16.msra.mxu0 %v395_v63 }
 0x6a5   :  { %1922 = vmatprep.subr.bf16.mxu0 %v2255_v41  ;;  %v2099_v38 = vpop.eup %2098 }
 0x6a6   :  { %v512_v4 = vmul.f32 %v2099_v38, %v2087_v39  ;;  %v721_v38 = vsub.s32 2, %v2344_v20 }
 0x6a7   :  { %1913 = vmatmul.mubr.msk.bf16.vlgmr.msra.gmra.mxu0 %vm247_vm3, %v270_v44  ;;  %v637_v8 = vpop.permute.xlu0 %636 }
 0x6a8   :  { %1923 = vmatpush3.bf16.msra.mxu0 %v195_v49  ;;  %1924 = vmatprep.mubr.msk.bf16.mxu0 %vm2256_vm1, %v2255_v41 }
 0x6a9   :  { %v2101_v3 = vpop.eup %2100  ;;  %1934 = vmatprep.subr.bf16.mxu0 %v2255_v41 }
 0x6aa   :  { %v513_v5 = vmul.f32 %v2101_v3, %v2089_v42 }
 0x6ac   :  { %v514_v6 = vpack.c.bf16 %v513_v5, %v512_v4  ;;  %v722_v5 = vrot.slane %v2347_v22, %v721_v38 }
 0x6ad   :  { %v2103_v7 = vpop.eup %2102 }
 0x6ae   :  { %v632_v10 = vmul.f32 %v2103_v7, %v2091_v45 }
 0x6af   :  { %1925 = vmatmul.mubr.msk.bf16.vlgmr.msra.gmra.mxu0 %vm247_vm3, %v514_v6  ;;  %v727_v6 = vsub.s32 3, %v2344_v20 }
 0x6b0   :  { %1935 = vmatpush3.bf16.msra.mxu0 %v637_v8  ;;  %1936 = vmatprep.mubr.msk.bf16.mxu0 %vm2256_vm1, %v2255_v41 }
 0x6b1   :  { %v2105_v9 = vpop.eup %2104  ;;  %1948 = vmatprep.subr.bf16.mxu0 %v2255_v41 }
 0x6b2   :  { %v633_v11 = vmul.f32 %v2105_v9, %v2093_v47 }
 0x6b4   :  { %v634_v12 = vpack.c.bf16 %v633_v11, %v632_v10  ;;  %v728_v10 = vrot.slane %v2347_v22, %v727_v6 }
 0x6b7   :  { %1937 = vmatmul.mubr.msk.bf16.vlgmr.msra.gmra.mxu0 %vm247_vm3, %v634_v12 }
 0x6b8   :  { %1956 = vmatprep.mubr.msk.bf16.mxu0 %vm2256_vm1, %v2255_v41 }
 0x767   :  { %v434_v13 = vpop.f32.mrf.mxu0 }
 0x768   :  { %v435_v25 = vadd.f32 %v434_v13, %v2422_v53 }
 0x769   :  { %v1914_v14 = vpop.f32.mrf.mxu0 }
 0x76b   :  { %v437_v15 = vpop.f32.mrf.mxu0 }
 0x76c   :  { %v438_v30 = vadd.f32 %v437_v15, %v2424_v57  ;;  %v2054_v15 = vld [vmem:[%s2721_s4 + $0x18] sm:$0xff]  }
 0x76d   :  { %v1915_v16 = vpop.f32.mrf.mxu0  ;;  %1949 = vmatpush3.bf16.msra.mxu0 %v2054_v15  ;;  %v2063_v15 = vld [vmem:[%s2719_s2 + $0x24] ss:$8 sps:$4 sm:$0xff]  }
 0x76e   :  { %1950 = vmatprep.subr.bf16.mxu0 %v2255_v41  ;;  %v2055_v16 = vld [vmem:[%s2721_s4 + $0x10] sm:$0xff]  }
 0x76f   :  { %v552_v18 = vpop.f32.mrf.mxu0 }
 0x770   :  { %v559_v28 = vadd.f32 %v552_v18, %v435_v25  ;;  %v2056_v18 = vld [vmem:[%s2721_s4 + $0x8] sm:$0xff]  }
 0x771   :  { %v1926_v19 = vpop.f32.mrf.mxu0  ;;  %1951 = vmatpush3.bf16.msra.mxu0 %v2055_v16  ;;  %v2061_v16 = vld [vmem:[%s2719_s2 + $0x20] ss:$8 sps:$4 sm:$0xff]  }
 0x772   :  { %1952 = vmatprep.subr.bf16.mxu0 %v2255_v41 }
 0x773   :  { %v555_v24 = vpop.f32.mrf.mxu0 }
 0x774   :  { %v560_v35 = vadd.f32 %v555_v24, %v438_v30 }
 0x775   :  { %v1927_v27 = vpop.f32.mrf.mxu0  ;;  %1953 = vmatpush3.bf16.msra.mxu0 %v2056_v18 }
 0x776   :  { %1954 = vmatprep.subr.bf16.mxu0 %v2255_v41 }
 0x777   :  { %v676_v29 = vpop.f32.mrf.mxu0 }
 0x778   :  { %v683_v31 = vadd.f32 %v676_v29, %v559_v28 }
 0x779   :  { %v1938_v34 = vpop.f32.mrf.mxu0 }
 0x77a   :  { %v685_v36 = vadd.f32 %v683_v31, %v2319_v0 }
 0x77b   :  { %v679_v37 = vpop.f32.mrf.mxu0 }
 0x77c   :  { %v2464_v39 = vadd.f32 %v690_v33, %v685_v36  ;;  %v684_v53 = vadd.f32 %v679_v37, %v560_v35 }
 0x77d   :  { %v1939_v40 = vpop.f32.mrf.mxu0 }
 0x77e   :  { %v686_v42 = vadd.f32 %v684_v53, %v2321_v1  ;;  %v693_v43 = vsel %vm71_vm0, %v2464_v39, 0.0 }
 0x77f   :  { %694 = vadd.xlane.f32.xlu1 %v693_v43 }
 0x780   :  { %v2469_v57 = vadd.f32 %v690_v33, %v686_v42 }
 0x782   :  { %v696_v45 = vsel %vm71_vm0, %v2469_v57, 0.0 }
 0x783   :  { %697 = vadd.xlane.f32.xlu0 %v696_v45 }
 0x808   :  { %v695_v46 = vpop.xlane.xlu1 %694 }
 0x809   :  { %v699_v47 = vmul.f32 0.03125, %v695_v46 }
 0x80b   :  { %v701_v0 = vsub.f32 %v2464_v39, %v699_v47 }
 0x80c   :  { %v698_v48 = vpop.xlane.xlu0 %697 }
 0x80d   :  { %v700_v49 = vmul.f32 0.03125, %v698_v48  ;;  %v703_v51 = vmul.f32 %v701_v0, %v701_v0 }
 0x80f   :  { %v702_v52 = vsub.f32 %v2469_v57, %v700_v49  ;;  %v705_v1 = vsel %vm71_vm0, %v703_v51, 0.0 }
 0x810   :  { %706 = vadd.xlane.f32.xlu1 %v705_v1 }
 0x811   :  { %v704_v54 = vmul.f32 %v702_v52, %v702_v52 }
 0x813   :  { %v708_v55 = vsel %vm71_vm0, %v704_v54, 0.0  ;;  %v895_v54 = vsub.s32 5, %v2344_v20 }
 0x814   :  { %709 = vadd.xlane.f32.xlu0 %v708_v55 }
 0x815   :  { %v896_v55 = vrot.slane %v2347_v22, %v895_v54 }
 0x821   :  { %748 = vrot.lane.b32.xlu1 %v2352_v23, %s2264_s29 }
 0x825   :  { %1012 = vrot.lane.b32.xlu1 %v2484_v59, %s2254_s19 }
 0x899   :  { %v707_v23 = vpop.xlane.xlu1 %706 }
 0x89a   :  { %v711_v63 = vmul.f32 0.03125, %v707_v23 }
 0x89c   :  { %v713_v50 = vadd.f32 1e-05, %v711_v63 }
 0x89d   :  { %v710_v21 = vpop.xlane.xlu0 %709  ;;  %v749_v19 = vpop.permute.xlu1 %748 }
 0x89e   :  { %2106 = vrsqrt.f32 %v713_v50  ;;  %v712_v2 = vmul.f32 0.03125, %v710_v21 }
 0x8a0   :  { %v714_v44 = vadd.f32 1e-05, %v712_v2 }
 0x8a2   :  { %2108 = vrsqrt.f32 %v714_v44 }
 0x8ab   :  { %v2107_v3 = vpop.eup %2106 }
 0x8ac   :  { %v717_v4 = vmul.f32 %v2107_v3, %v701_v0 }
 0x8ae   :  { %v723_v9 = vmul.f32 %v722_v5, %v717_v4 }
 0x8af   :  { %v2109_v7 = vpop.eup %2108 }
 0x8b0   :  { %v718_v8 = vmul.f32 %v2109_v7, %v702_v52  ;;  %v729_v12 = vadd.f32 %v728_v10, %v723_v9 }
 0x8b2   :  { %v724_v11 = vmul.f32 %v722_v5, %v718_v8 }
 0x8b4   :  { %v730_v13 = vadd.f32 %v728_v10, %v724_v11 }
 0x8b6   :  { %v731_v14 = vpack.c.bf16 %v730_v13, %v729_v12  ;;  %v2060_v13 = vld [vmem:[%s2719_s2 + $0x34] ss:$8 sps:$4 sm:$0xff]  }
 0x8b7   :  { %980 = vmatprep.subr.bf16.mxu1 %v2060_v13 }
 0x8b8   :  { %1945 = vmatmul.mubr.msk.bf16.vlgmr.msra.gmra.mxu1 %vm71_vm0, %v731_v14  ;;  %v2058_v14 = vld [vmem:[%s2719_s2 + $0x30] ss:$8 sps:$4 sm:$0xff]  }
 0x8b9   :  { %1000 = vmatprep.mubr.bf16.mxu1 %v2253_v17  ;;  %v2057_v17 = vld [vmem:[%s2721_s4] sm:$0xff]   ;;  %981 = vmatpush1.bf16.msra.mxu1 %v2058_v14 }
 0x8ba   :  { %1955 = vmatpush3.bf16.msra.mxu0 %v2057_v17  ;;  %982 = vmatprep.subr.bf16.mxu1 %v2063_v15 }
 0x8bb   :  { %1966 = vmatprep.subr.bf16.mxu0 %v2255_v41 }
 0x8bd   :  { %983 = vmatpush1.bf16.msra.mxu1 %v2061_v16 }
 0x8be   :  { %1960 = vmatprep.subr.bf16.mxu1 %v2255_v41 }
 0x978   :  { %v788_v24 = vpop.f32.mrf.mxu1 }
 0x979   :  { %v789_v25 = vadd.f32 %v788_v24, %v749_v19 }
 0x97a   :  { %v1946_v27 = vpop.f32.mrf.mxu1 }
 0x97b   :  { %v795_v28 = vmul.f32 %v789_v25, %v789_v25 }
 0x97c   :  { %v791_v29 = vpop.f32.mrf.mxu1 }
 0x97d   :  { %v797_v30 = vmul.f32 %v795_v28, %v789_v25  ;;  %v792_v31 = vadd.f32 %v791_v29, %v749_v19 }
 0x97e   :  { %v1947_v33 = vpop.f32.mrf.mxu1 }
 0x97f   :  { %v799_v34 = vmul.f32 0.044715, %v797_v30  ;;  %v796_v35 = vmul.f32 %v792_v31, %v792_v31 }
 0x981   :  { %v801_v36 = vadd.f32 %v799_v34, %v789_v25  ;;  %v798_v37 = vmul.f32 %v796_v35, %v792_v31 }
 0x983   :  { %v803_v53 = vmul.f32 0.7978846, %v801_v36  ;;  %v800_v40 = vmul.f32 0.044715, %v798_v37 }
 0x985   :  { %2110 = vtanh.f32 %v803_v53  ;;  %v802_v42 = vadd.f32 %v800_v40, %v792_v31  ;;  %v1013_v40 = vpop.permute.xlu1 %1012 }
 0x987   :  { %v804_v43 = vmul.f32 0.7978846, %v802_v42 }
 0x989   :  { %2112 = vtanh.f32 %v804_v43 }
 0x992   :  { %v2111_v45 = vpop.eup %2110 }
 0x993   :  { %v807_v46 = vadd.f32 1.0, %v2111_v45 }
 0x995   :  { %v809_v0 = vmul.f32 0.5, %v807_v46 }
 0x996   :  { %v2113_v47 = vpop.eup %2112 }
 0x997   :  { %v808_v48 = vadd.f32 1.0, %v2113_v47  ;;  %v811_v51 = vmul.f32 %v809_v0, %v789_v25 }
 0x999   :  { %v810_v49 = vmul.f32 0.5, %v808_v48 }
 0x99b   :  { %v812_v52 = vmul.f32 %v810_v49, %v792_v31  ;;  %v936_v31 = vrot.slane %v2477_v56, %v107_v32 }
 0x99d   :  { %v813_v1 = vpack.c.bf16 %v812_v52, %v811_v51 }
 0x99f   :  { %1957 = vmatmul.mubr.msk.bf16.vlgmr.msra.gmra.mxu0 %vm846_vm4, %v813_v1 }
 0x9a0   :  { %1968 = vmatprep.mubr.msk.bf16.mxu0 %vm2256_vm1, %v2255_v41 }
 0xa5f   :  { %v884_v60 = vpop.f32.mrf.mxu0 }
 0xa60   :  { %v891_v61 = vadd.f32 %v884_v60, %v2464_v39 }
 0xa61   :  { %v1958_v23 = vpop.f32.mrf.mxu0 }
 0xa62   :  { %v2529_v63 = vadd.f32 %v896_v55, %v891_v61 }
 0xa63   :  { %v887_v50 = vpop.f32.mrf.mxu0 }
 0xa64   :  { %v892_v21 = vadd.f32 %v887_v50, %v2469_v57  ;;  %v901_v2 = vsel %vm71_vm0, %v2529_v63, 0.0 }
 0xa65   :  { %902 = vadd.xlane.f32.xlu0 %v901_v2  ;;  %v1959_v44 = vpop.f32.mrf.mxu0 }
 0xa66   :  { %v2534_v3 = vadd.f32 %v896_v55, %v892_v21 }
 0xa68   :  { %v904_v4 = vsel %vm71_vm0, %v2534_v3, 0.0 }
 0xa69   :  { %905 = vadd.xlane.f32.xlu0 %v904_v4 }
 0xaee   :  { %v903_v22 = vpop.xlane.xlu0 %902 }
 0xaef   :  { %v907_v5 = vmul.f32 0.03125, %v903_v22 }
 0xaf1   :  { %v909_v39 = vsub.f32 %v2529_v63, %v907_v5 }
 0xaf2   :  { %v906_v7 = vpop.xlane.xlu0 %905 }
 0xaf3   :  { %v908_v8 = vmul.f32 0.03125, %v906_v7  ;;  %v911_v9 = vmul.f32 %v909_v39, %v909_v39 }
 0xaf5   :  { %v910_v57 = vsub.f32 %v2534_v3, %v908_v8  ;;  %v913_v10 = vsel %vm71_vm0, %v911_v9, 0.0 }
 0xaf6   :  { %914 = vadd.xlane.f32.xlu0 %v913_v10 }
 0xaf7   :  { %v912_v11 = vmul.f32 %v910_v57, %v910_v57 }
 0xaf9   :  { %v916_v12 = vsel %vm71_vm0, %v912_v11, 0.0 }
 0xafa   :  { %917 = vadd.xlane.f32.xlu0 %v916_v12 }
 0xb7f   :  { %v915_v18 = vpop.xlane.xlu0 %914 }
 0xb80   :  { %v919_v17 = vmul.f32 0.03125, %v915_v18 }
 0xb82   :  { %v921_v19 = vadd.f32 1e-05, %v919_v17 }
 0xb83   :  { %v918_v24 = vpop.xlane.xlu0 %917 }
 0xb84   :  { %2114 = vrsqrt.f32 %v921_v19  ;;  %v920_v25 = vmul.f32 0.03125, %v918_v24 }
 0xb86   :  { %v922_v27 = vadd.f32 1e-05, %v920_v25 }
 0xb88   :  { %2116 = vrsqrt.f32 %v922_v27 }
 0xb91   :  { %v2115_v28 = vpop.eup %2114 }
 0xb92   :  { %v925_v29 = vmul.f32 %v2115_v28, %v909_v39 }
 0xb94   :  { %v931_v34 = vmul.f32 %v2484_v59, %v925_v29 }
 0xb95   :  { %v2117_v30 = vpop.eup %2116 }
 0xb96   :  { %v926_v33 = vmul.f32 %v2117_v30, %v910_v57  ;;  %v937_v36 = vadd.f32 %v936_v31, %v931_v34 }
 0xb98   :  { %v932_v35 = vmul.f32 %v2484_v59, %v926_v33 }
 0xb9a   :  { %v938_v37 = vadd.f32 %v936_v31, %v932_v35 }
 0xb9c   :  { %v939_v53 = vpack.c.bf16 %v938_v37, %v937_v36 }
 0xb9e   :  { %1815 = vmatmul.mubr.msk.bf16.vlgmr.msra.gmra.mxu1 %vm71_vm0, %v939_v53 }
 0xb9f   :  { %1962 = vmatprep.mubr.msk.bf16.mxu1 %vm2256_vm1, %v2255_v41 }
 0xc5e   :  { %v1002_v42 = vpop.f32.mrf.mxu1 }
 0xc5f   :  { %v1015_v45 = vadd.f32 %v1013_v40, %v1002_v42  ;;  %v1020_v32 = vadd.f32 %v1002_v42, %v936_v31 }
 0xc60   :  { %v2563_v43 = vpop.f32.mrf.mxu1 }
 0xc61   :  { %v1017_v49 = vmul.f32 0.35355338, %v1015_v45 }
 0xc62   :  { %v1006_v46 = vpop.f32.mrf.mxu1 }
 0xc63   :  { %v1016_v47 = vadd.f32 %v1013_v40, %v1006_v46  ;;  %v1021_v0 = vadd.f32 %v1006_v46, %v936_v31  ;;  %v2565_v48 = vpack.c.bf16 %v1006_v46, %v1002_v42 }
 0xc64   :  { %v2606_v37 = vpop.f32.mrf.mxu1 }
 0xc65   :  { %v1018_v51 = vmul.f32 0.35355338, %v1016_v47  ;;  %v1022_v52 = vpack.c.bf16 %v1021_v0, %v1020_v32 }
 0xc67   :  { %v1019_v1 = vpack.c.bf16 %v1018_v51, %v1017_v49  ;;  %1101 = vrot.lane.b32.xlu0 %v1022_v52, %s2257_s20 }
 0xc69   :  { %1099 = vrot.lane.b32.xlu1 %v1019_v1, %s2258_s21 }
 0xcd9   :  { %v1102_v55 = vpop.permute.xlu0 %1101 }
 0xcda   :  { %v1107_v60 = vsel %vm199_vm2, %v1102_v55, 0 }
 0xcdb   :  { %1967 = vmatpush3.bf16.xpose.msra.mxu0 %v1107_v60  ;;  %v1100_v61 = vpop.permute.xlu1 %1099 }
 0xcdc   :  { %1978 = vmatprep.subr.bf16.mxu0 %v2255_v41 }
 0xce2   :  { %1969 = vmatmul.mubr.msk.bf16.vlgmr.msra.gmra.mxu0 %vm199_vm2, %v1100_v61 }
 0xce3   :  { %1980 = vmatprep.mubr.msk.bf16.mxu0 %vm2256_vm1, %v2255_v41 }
 0xda2   :  { %v1143_v23 = vpop.f32.mrf.mxu0 }
 0xda3   :  { %v1144_v50 = vadd.f32 %v1143_v23, %v2380_v58 }
 0xda4   :  { %v1970_v21 = vpop.f32.mrf.mxu0 }
 0xda5   :  { %v1150_v2 = vsel %vm247_vm3, %v1144_v50, -inf }
 0xda6   :  { %1151 = vmax.xlane.f32.xlu1 %v1150_v2  ;;  %v1146_v44 = vpop.f32.mrf.mxu0 }
 0xda7   :  { %v1147_v4 = vadd.f32 %v1146_v44, %v2383_v62 }
 0xda8   :  { %v1971_v22 = vpop.f32.mrf.mxu0 }
 0xda9   :  { %v1153_v5 = vsel %vm247_vm3, %v1147_v4, -inf }
 0xdaa   :  { %1154 = vmax.xlane.f32.xlu0 %v1153_v5 }
 0xdb7   :  { %1026 = vrot.lane.b32.xlu1 %v1022_v52, %s2254_s19 }
 0xdbb   :  { %1270 = vrot.lane.b32.xlu1 %v1022_v52, %s2259_s22 }
 0xdc0   :  { %1174 = vrot.lane.b32.xlu0 %v2565_v48, %s2262_s25 }
 0xdc4   :  { %1388 = vrot.lane.b32.xlu0 %v1019_v1, %s2263_s28 }
 0xe2f   :  { %v1152_v39 = vpop.xlane.xlu1 %1151 }
 0xe30   :  { %v1156_v7 = vsub.f32 %v1144_v50, %v1152_v39 }
 0xe32   :  { %v1158_v8 = vmul.f32 1.442695, %v1156_v7 }
 0xe33   :  { %v1027_v9 = vpop.permute.xlu1 %1026  ;;  %v1155_v57 = vpop.xlane.xlu0 %1154 }
 0xe34   :  { %2118 = vpow2.f32 %v1158_v8  ;;  %v1032_v10 = vsel %vm199_vm2, %v1027_v9, 0  ;;  %v1157_v11 = vsub.f32 %v1147_v4, %v1155_v57 }
 0xe35   :  { %1961 = vmatpush3.bf16.xpose.msra.mxu1 %v1032_v10 }
 0xe36   :  { %v1160_v12 = vmul.f32 1.442695, %v1157_v11  ;;  %1972 = vmatprep.subr.bf16.mxu1 %v2255_v41 }
 0xe37   :  { %v1175_v13 = vpop.permute.xlu0 %1174  ;;  %v1271_v17 = vpop.permute.xlu1 %1270 }
 0xe38   :  { %2120 = vpow2.f32 %v1160_v12  ;;  %v1276_v33 = vsel %vm199_vm2, %v1271_v17, 0 }
 0xe3b   :  { %v1389_v36 = vpop.permute.xlu0 %1388 }
 0xe3c   :  { %1963 = vmatmul.mubr.msk.bf16.vlgmr.msra.gmra.mxu1 %vm199_vm2, %v1019_v1 }
 0xe3d   :  { %1973 = vmatpush3.bf16.msra.mxu1 %v1175_v13  ;;  %1974 = vmatprep.mubr.msk.bf16.mxu1 %vm2256_vm1, %v2255_v41 }
 0xe3e   :  { %1984 = vmatprep.subr.bf16.mxu1 %v2255_v41 }
 0xe41   :  { %v2119_v14 = vpop.eup %2118 }
 0xe42   :  { %v1162_v15 = vsel %vm247_vm3, %v2119_v14, 0.0 }
 0xe43   :  { %1163 = vadd.xlane.f32.xlu1 %v1162_v15 }
 0xe45   :  { %v2121_v16 = vpop.eup %2120 }
 0xe46   :  { %v1165_v18 = vsel %vm247_vm3, %v2121_v16, 0.0 }
 0xe47   :  { %1166 = vadd.xlane.f32.xlu1 %v1165_v18 }
 0xe58   :  { %1268 = vrot.lane.b32.xlu1 %v1019_v1, %s2260_s23 }
 0xe5c   :  { %1390 = vrot.lane.b32.xlu1 %v1022_v52, %s2261_s24 }
 0xecc   :  { %v1164_v19 = vpop.xlane.xlu1 %1163 }
 0xecd   :  { %2122 = vrcp.f32 %v1164_v19 }
 0xed0   :  { %v1167_v24 = vpop.xlane.xlu1 %1166 }
 0xed1   :  { %2124 = vrcp.f32 %v1167_v24 }
 0xed4   :  { %v1269_v31 = vpop.permute.xlu1 %1268 }
 0xed8   :  { %v1391_v34 = vpop.permute.xlu1 %1390 }
 0xed9   :  { %v1396_v35 = vsel %vm199_vm2, %v1391_v34, 0 }
 0xeda   :  { %v2123_v25 = vpop.eup %2122 }
 0xedb   :  { %v1170_v28 = vmul.f32 %v2123_v25, %v2119_v14 }
 0xede   :  { %v2125_v27 = vpop.eup %2124 }
 0xedf   :  { %v1171_v29 = vmul.f32 %v2125_v27, %v2121_v16 }
 0xee1   :  { %v1172_v30 = vpack.c.bf16 %v1171_v29, %v1170_v28 }
 0xee3   :  { %1975 = vmatmul.mubr.msk.bf16.vlgmr.msra.gmra.mxu1 %vm247_vm3, %v1172_v30 }
 0xee4   :  { %1985 = vmatpush3.bf16.xpose.msra.mxu1 %v1276_v33  ;;  %1986 = vmatprep.mubr.msk.bf16.mxu1 %vm2256_vm1, %v2255_v41 }
 0xee5   :  { %1996 = vmatprep.subr.bf16.mxu1 %v2255_v41 }
 0xeeb   :  { %1987 = vmatmul.mubr.msk.bf16.vlgmr.msra.gmra.mxu1 %vm199_vm2, %v1269_v31 }
 0xeec   :  { %1997 = vmatpush3.bf16.xpose.msra.mxu1 %v1396_v35  ;;  %1998 = vmatprep.mubr.msk.bf16.mxu1 %vm2256_vm1, %v2255_v41 }
 0xeed   :  { %2008 = vmatprep.subr.bf16.mxu1 %v2255_v41 }
 0xef3   :  { %1999 = vmatmul.mubr.msk.bf16.vlgmr.msra.gmra.mxu1 %vm199_vm2, %v1389_v36 }
 0xef4   :  { %2012 = vmatprep.mubr.msk.bf16.mxu1 %vm2256_vm1, %v2255_v41 }
 0xefc   :  { %v1068_v53 = vpop.f32.mrf.mxu1 }
 0xefd   :  { %v1069_v40 = vadd.f32 %v1068_v53, %v2380_v58 }
 0xefe   :  { %v1964_v42 = vpop.f32.mrf.mxu1 }
 0xeff   :  { %v1075_v45 = vsel %vm247_vm3, %v1069_v40, -inf }
 0xf00   :  { %v1071_v46 = vpop.f32.mrf.mxu1  ;;  %1076 = vmax.xlane.f32.xlu1 %v1075_v45 }
 0xf01   :  { %v1072_v32 = vadd.f32 %v1071_v46, %v2383_v62 }
 0xf02   :  { %v1965_v47 = vpop.f32.mrf.mxu1 }
 0xf03   :  { %v1078_v0 = vsel %vm247_vm3, %v1072_v32, -inf }
 0xf04   :  { %1079 = vmax.xlane.f32.xlu0 %v1078_v0  ;;  %v1024_v0 = vpack.c.bf16 %v2606_v37, %v2563_v43 }
 0xf89   :  { %v1077_v49 = vpop.xlane.xlu1 %1076 }
 0xf8a   :  { %v1081_v51 = vsub.f32 %v1069_v40, %v1077_v49 }
 0xf8c   :  { %v1083_v60 = vmul.f32 1.442695, %v1081_v51 }
 0xf8d   :  { %v1080_v52 = vpop.xlane.xlu0 %1079 }
 0xf8e   :  { %v1082_v61 = vsub.f32 %v1072_v32, %v1080_v52  ;;  %2126 = vpow2.f32 %v1083_v60 }
 0xf90   :  { %v1085_v21 = vmul.f32 1.442695, %v1082_v61 }
 0xf92   :  { %2128 = vpow2.f32 %v1085_v21 }
 0xf9b   :  { %v2127_v12 = vpop.eup %2126 }
 0xf9c   :  { %v1087_v16 = vsel %vm247_vm3, %v2127_v12, 0.0 }
 0xf9f   :  { %v2129_v17 = vpop.eup %2128 }
 0xfa0   :  { %v1090_v19 = vsel %vm247_vm3, %v2129_v17, 0.0 }
 0xfa3   :  { %v2612_v1 = vpop.f32.mrf.mxu1 }
 0xfa5   :  { %v1976_v55 = vpop.f32.mrf.mxu1 }
 0xfa7   :  { %v2614_v23 = vpop.f32.mrf.mxu1 }
 0xfa9   :  { %v1977_v50 = vpop.f32.mrf.mxu1 }
 0xfab   :  { %v1312_v2 = vpop.f32.mrf.mxu1 }
 0xfac   :  { %v1313_v44 = vadd.f32 %v1312_v2, %v2380_v58 }
 0xfad   :  { %v1988_v4 = vpop.f32.mrf.mxu1 }
 0xfae   :  { %v1319_v22 = vsel %vm247_vm3, %v1313_v44, -inf }
 0xfaf   :  { %1320 = vmax.xlane.f32.xlu0 %v1319_v22  ;;  %v1315_v5 = vpop.f32.mrf.mxu1 }
 0xfb0   :  { %v1316_v39 = vadd.f32 %v1315_v5, %v2383_v62 }
 0xfb1   :  { %v1989_v7 = vpop.f32.mrf.mxu1 }
 0xfb2   :  { %v1322_v8 = vsel %vm247_vm3, %v1316_v39, -inf }
 0xfb3   :  { %1323 = vmax.xlane.f32.xlu0 %v1322_v8  ;;  %v1432_v9 = vpop.f32.mrf.mxu1 }
 0xfb4   :  { %v1433_v57 = vadd.f32 %v1432_v9, %v2380_v58 }
 0xfb5   :  { %v2000_v10 = vpop.f32.mrf.mxu1 }
 0xfb6   :  { %v1439_v11 = vsel %vm247_vm3, %v1433_v57, -inf }
 0xfb7   :  { %1440 = vmax.xlane.f32.xlu1 %v1439_v11  ;;  %v1435_v13 = vpop.f32.mrf.mxu1 }
 0xfb8   :  { %v1436_v14 = vadd.f32 %v1435_v13, %v2383_v62 }
 0xfb9   :  { %v2001_v15 = vpop.f32.mrf.mxu1 }
 0xfba   :  { %v1442_v18 = vsel %vm247_vm3, %v1436_v14, -inf }
 0xfbb   :  { %1088 = vadd.xlane.f32.xlu1 %v1087_v16  ;;  %1443 = vmax.xlane.f32.xlu0 %v1442_v18 }
 0xfbf   :  { %1091 = vadd.xlane.f32.xlu0 %v1090_v19 }
0x1038   :  { %v1321_v58 = vpop.xlane.xlu0 %1320 }
0x1039   :  { %v1325_v24 = vsub.f32 %v1313_v44, %v1321_v58 }
0x103b   :  { %v1327_v25 = vmul.f32 1.442695, %v1325_v24 }
0x103c   :  { %v1324_v27 = vpop.xlane.xlu0 %1323 }
0x103d   :  { %2130 = vpow2.f32 %v1327_v25  ;;  %v1326_v28 = vsub.f32 %v1316_v39, %v1324_v27 }
0x103f   :  { %v1329_v29 = vmul.f32 1.442695, %v1326_v28 }
0x1040   :  { %v1441_v30 = vpop.xlane.xlu1 %1440 }
0x1041   :  { %2132 = vpow2.f32 %v1329_v29  ;;  %v1445_v62 = vsub.f32 %v1433_v57, %v1441_v30  ;;  %v1517_v29 = vrot.slane %v2477_v56, %v689_v26 }
0x1043   :  { %v1447_v31 = vmul.f32 1.442695, %v1445_v62 }
0x1044   :  { %v1444_v33 = vpop.xlane.xlu0 %1443  ;;  %v1089_v51 = vpop.xlane.xlu1 %1088 }
0x1045   :  { %2134 = vpow2.f32 %v1447_v31  ;;  %v1446_v34 = vsub.f32 %v1436_v14, %v1444_v33 }
0x1047   :  { %v1449_v35 = vmul.f32 1.442695, %v1446_v34 }
0x1048   :  { %v1092_v49 = vpop.xlane.xlu0 %1091 }
0x1049   :  { %2136 = vpow2.f32 %v1449_v35 }
0x104a   :  { %v2131_v36 = vpop.eup %2130  ;;  %2138 = vrcp.f32 %v1092_v49 }
0x104b   :  { %v1331_v53 = vsel %vm247_vm3, %v2131_v36, 0.0  ;;  %2140 = vrcp.f32 %v1089_v51  ;;  %v2064_v51 = vld [vmem:[%s2720_s3 + $0x18] sm:$0xff]  }
0x104c   :  { %1332 = vadd.xlane.f32.xlu1 %v1331_v53  ;;  %2009 = vmatpush3.bf16.msra.mxu1 %v2064_v51 }
0x104d   :  { %2010 = vmatprep.subr.bf16.mxu1 %v2255_v41 }
0x104e   :  { %v2133_v40 = vpop.eup %2132 }
0x104f   :  { %v1334_v42 = vsel %vm247_vm3, %v2133_v40, 0.0 }
0x1050   :  { %1335 = vadd.xlane.f32.xlu0 %v1334_v42 }
0x1052   :  { %v2135_v45 = vpop.eup %2134 }
0x1053   :  { %v1451_v46 = vsel %vm247_vm3, %v2135_v45, 0.0 }
0x1054   :  { %1452 = vadd.xlane.f32.xlu1 %v1451_v46 }
0x1056   :  { %v2137_v32 = vpop.eup %2136 }
0x1057   :  { %v1454_v47 = vsel %vm247_vm3, %v2137_v32, 0.0  ;;  %v2139_v60 = vpop.eup %2138 }
0x1058   :  { %1455 = vadd.xlane.f32.xlu0 %v1454_v47  ;;  %v2141_v50 = vpop.eup %2140  ;;  %v1096_v21 = vmul.f32 %v2139_v60, %v2129_v17 }
0x1059   :  { %v1095_v44 = vmul.f32 %v2141_v50, %v2127_v12 }
0x105b   :  { %v1097_v43 = vpack.c.bf16 %v1096_v21, %v1095_v44  ;;  %v1549_v44 = vrot.slane %v2477_v56, %v721_v38  ;;  %v2067_v38 = vld [vmem:[%s2721_s4 + $0x30] sm:$0xff]  }
0x1065   :  { %1221 = vrot.lane.b32.xlu1 %v2565_v48, %s2264_s29 }
0x106e   :  { %1463 = vrot.lane.b32.xlu0 %v1024_v0, %s2254_s19 }
0x10d5   :  { %v1333_v52 = vpop.xlane.xlu1 %1332 }
0x10d6   :  { %2142 = vrcp.f32 %v1333_v52  ;;  %v2065_v52 = vld [vmem:[%s2720_s3 + $0x10] sm:$0xff]  }
0x10d7   :  { %2011 = vmatpush3.bf16.msra.mxu1 %v2065_v52 }
0x10d9   :  { %v1336_v55 = vpop.xlane.xlu0 %1335 }
0x10da   :  { %2144 = vrcp.f32 %v1336_v55 }
0x10dd   :  { %v1453_v61 = vpop.xlane.xlu1 %1452 }
0x10de   :  { %2146 = vrcp.f32 %v1453_v61 }
0x10e1   :  { %v1222_v2 = vpop.permute.xlu1 %1221  ;;  %v1456_v48 = vpop.xlane.xlu0 %1455 }
0x10e2   :  { %2148 = vrcp.f32 %v1456_v48  ;;  %1979 = vmatpush3.bf16.msra.mxu0 %v1222_v2 }
0x10e3   :  { %1990 = vmatprep.subr.bf16.mxu0 %v2255_v41  ;;  %v2143_v37 = vpop.eup %2142 }
0x10e4   :  { %v1339_v22 = vmul.f32 %v2143_v37, %v2131_v36 }
0x10e5   :  { %1981 = vmatmul.mubr.msk.bf16.vlgmr.msra.gmra.mxu0 %vm247_vm3, %v1097_v43  ;;  %v1464_v8 = vpop.permute.xlu0 %1463 }
0x10e6   :  { %1991 = vmatpush3.bf16.msra.mxu0 %v1024_v0  ;;  %1992 = vmatprep.mubr.msk.bf16.mxu0 %vm2256_vm1, %v2255_v41 }
0x10e7   :  { %v2145_v4 = vpop.eup %2144  ;;  %2002 = vmatprep.subr.bf16.mxu0 %v2255_v41 }
0x10e8   :  { %v1340_v5 = vmul.f32 %v2145_v4, %v2133_v40 }
0x10ea   :  { %v1341_v39 = vpack.c.bf16 %v1340_v5, %v1339_v22  ;;  %v1555_v22 = vrot.slane %v2477_v56, %v727_v6  ;;  %v2068_v6 = vld [vmem:[%s2721_s4 + $0x28] sm:$0xff]  }
0x10eb   :  { %v2147_v7 = vpop.eup %2146 }
0x10ec   :  { %v1459_v57 = vmul.f32 %v2147_v7, %v2135_v45 }
0x10ed   :  { %1993 = vmatmul.mubr.msk.bf16.vlgmr.msra.gmra.mxu0 %vm247_vm3, %v1341_v39 }
0x10ee   :  { %2003 = vmatpush3.bf16.msra.mxu0 %v1464_v8  ;;  %2004 = vmatprep.mubr.msk.bf16.mxu0 %vm2256_vm1, %v2255_v41 }
0x10ef   :  { %v2149_v9 = vpop.eup %2148  ;;  %2016 = vmatprep.subr.bf16.mxu0 %v2255_v41 }
0x10f0   :  { %v1460_v10 = vmul.f32 %v2149_v9, %v2137_v32  ;;  %v2066_v9 = vld [vmem:[%s2721_s4 + $0x38] sm:$0xff]  }
0x10f2   :  { %v1461_v11 = vpack.c.bf16 %v1460_v10, %v1459_v57  ;;  %v2069_v57 = vld [vmem:[%s2721_s4 + $0x20] sm:$0xff]   ;;  %s2265_s4 = smov [#allocation8]  }
0x10f3   :  { %s1773_s11 = sshll.u32 %s2265_s4, 4  ;;  %s1774_s11 = int_to_ptr.vmem [resolvable:$true] %s1773_s11 }
0x10f4   :  { %s2222_s1 = scalar_lea.vmem %s1774_s11, 256  ;;  %p2227_p2 = scmp.lt.s32.totalorder %s1774_s11, %s1774_s11 }
0x10f5   :  { %2005 = vmatmul.mubr.msk.bf16.vlgmr.msra.gmra.mxu0 %vm247_vm3, %v1461_v11  ;;  %p2223_p1 = scmp.ne.s32.totalorder %s1774_s11, %s2222_s1  ;;  %p2228_p3 = scmp.lt.s32.totalorder %s2222_s1, %s2222_s1 }
0x10f6   :  { %2024 = vmatprep.mubr.msk.bf16.mxu0 %vm2256_vm1, %v2255_v41  ;;  %2017 = vmatpush3.bf16.msra.mxu0 %v2066_v9 }
0x10f7   :  { %2018 = vmatprep.subr.bf16.mxu0 %v2255_v41  ;;  %p2229_p4 = por %p2228_p3, %p2227_p2 }
0x10f9   :  { %p2230_p5 = pnand %p2229_p4, %p2223_p1 }
0x10fa   :  { %2019 = vmatpush3.bf16.msra.mxu0 %v2067_v38 }
0x10fb   :  { %2020 = vmatprep.subr.bf16.mxu0 %v2255_v41 }
0x10fe   :  { %2021 = vmatpush3.bf16.msra.mxu0 %v2068_v6 }
0x10ff   :  { %2022 = vmatprep.subr.bf16.mxu0 %v2255_v41 }
0x1102   :  { %2023 = vmatpush3.bf16.msra.mxu0 %v2069_v57 }
0x11a5   :  { %v1261_v12 = vpop.f32.mrf.mxu0 }
0x11a6   :  { %v1262_v19 = vadd.f32 %v1261_v12, %v2612_v1 }
0x11a7   :  { %v1982_v13 = vpop.f32.mrf.mxu0 }
0x11a9   :  { %v1264_v14 = vpop.f32.mrf.mxu0 }
0x11aa   :  { %v1265_v27 = vadd.f32 %v1264_v14, %v2614_v23 }
0x11ab   :  { %v1983_v15 = vpop.f32.mrf.mxu0 }
0x11ad   :  { %v1379_v16 = vpop.f32.mrf.mxu0 }
0x11ae   :  { %v1386_v24 = vadd.f32 %v1379_v16, %v1262_v19 }
0x11af   :  { %v1994_v18 = vpop.f32.mrf.mxu0 }
0x11b1   :  { %v1382_v17 = vpop.f32.mrf.mxu0 }
0x11b2   :  { %v1387_v62 = vadd.f32 %v1382_v17, %v1265_v27 }
0x11b3   :  { %v1995_v58 = vpop.f32.mrf.mxu0 }
0x11b5   :  { %v1503_v25 = vpop.f32.mrf.mxu0 }
0x11b6   :  { %v1510_v28 = vadd.f32 %v1503_v25, %v1386_v24 }
0x11b7   :  { %v2006_v30 = vpop.f32.mrf.mxu0 }
0x11b8   :  { %v1512_v31 = vadd.f32 %v1510_v28, %v2529_v63 }
0x11b9   :  { %v1506_v33 = vpop.f32.mrf.mxu0 }
0x11ba   :  { %v2653_v34 = vadd.f32 %v1517_v29, %v1512_v31  ;;  %v1511_v35 = vadd.f32 %v1506_v33, %v1387_v62 }
0x11bb   :  { %v2007_v36 = vpop.f32.mrf.mxu0 }
0x11bc   :  { %v1513_v1 = vadd.f32 %v1511_v35, %v2534_v3  ;;  %v1520_v53 = vsel %vm71_vm0, %v2653_v34, 0.0 }
0x11bd   :  { %1521 = vadd.xlane.f32.xlu1 %v1520_v53 }
0x11be   :  { %v2658_v23 = vadd.f32 %v1517_v29, %v1513_v1 }
0x11c0   :  { %v1523_v26 = vsel %vm71_vm0, %v2658_v23, 0.0 }
0x11c1   :  { %1524 = vadd.xlane.f32.xlu0 %v1523_v26 }
0x1246   :  { %v1522_v40 = vpop.xlane.xlu1 %1521 }
0x1247   :  { %v1526_v42 = vmul.f32 0.03125, %v1522_v40  ;;  %v1724_v40 = vrot.slane %v2477_v56, %v895_v54 }
0x1249   :  { %v1528_v63 = vsub.f32 %v2653_v34, %v1526_v42 }
0x124a   :  { %v1525_v45 = vpop.xlane.xlu0 %1524 }
0x124b   :  { %v1527_v46 = vmul.f32 0.03125, %v1525_v45  ;;  %v1530_v32 = vmul.f32 %v1528_v63, %v1528_v63 }
0x124d   :  { %v1529_v47 = vsub.f32 %v2658_v23, %v1527_v46  ;;  %v1532_v3 = vsel %vm71_vm0, %v1530_v32, 0.0 }
0x124e   :  { %1533 = vadd.xlane.f32.xlu1 %v1532_v3 }
0x124f   :  { %v1531_v0 = vmul.f32 %v1529_v47, %v1529_v47 }
0x1251   :  { %v1535_v49 = vsel %vm71_vm0, %v1531_v0, 0.0 }
0x1252   :  { %1536 = vadd.xlane.f32.xlu0 %v1535_v49 }
0x125f   :  { %1576 = vrot.lane.b32.xlu1 %v2484_v59, %s2264_s29 }
0x12d7   :  { %v1534_v55 = vpop.xlane.xlu1 %1533 }
0x12d8   :  { %v1538_v60 = vmul.f32 0.03125, %v1534_v55 }
0x12da   :  { %v1540_v61 = vadd.f32 1e-05, %v1538_v60 }
0x12db   :  { %v1537_v50 = vpop.xlane.xlu0 %1536  ;;  %v1577_v10 = vpop.permute.xlu1 %1576 }
0x12dc   :  { %2150 = vrsqrt.f32 %v1540_v61  ;;  %v1539_v21 = vmul.f32 0.03125, %v1537_v50 }
0x12de   :  { %v1541_v2 = vadd.f32 1e-05, %v1539_v21 }
0x12e0   :  { %2152 = vrsqrt.f32 %v1541_v2 }
0x12e9   :  { %v2151_v59 = vpop.eup %2150 }
0x12ea   :  { %v1544_v48 = vmul.f32 %v2151_v59, %v1528_v63 }
0x12ec   :  { %v1550_v4 = vmul.f32 %v1549_v44, %v1544_v48 }
0x12ed   :  { %v2153_v43 = vpop.eup %2152 }
0x12ee   :  { %v1545_v37 = vmul.f32 %v2153_v43, %v1529_v47  ;;  %v1556_v39 = vadd.f32 %v1555_v22, %v1550_v4  ;;  %v1756_v4 = vsub.s32 6, %v2344_v20 }
0x12f0   :  { %v1551_v5 = vmul.f32 %v1549_v44, %v1545_v37 }
0x12f2   :  { %v1557_v7 = vadd.f32 %v1555_v22, %v1551_v5  ;;  %v1727_v22 = vld [vmem:[#allocation7] sm:$0xff]  ;;  %v1762_v5 = vsub.s32 7, %v2344_v20 }
0x12f4   :  { %v1558_v8 = vpack.c.bf16 %v1557_v7, %v1556_v39  ;;  %v1757_v39 = vrot.slane %v1727_v22, %v1756_v4  ;;  %v1763_v9 = vrot.slane %v1727_v22, %v1762_v5 }
0x12f6   :  { %2013 = vmatmul.mubr.msk.bf16.vlgmr.msra.gmra.mxu1 %vm71_vm0, %v1558_v8 }
0x13b6   :  { %v1616_v11 = vpop.f32.mrf.mxu1 }
0x13b7   :  { %v1617_v12 = vadd.f32 %v1616_v11, %v1577_v10 }
0x13b8   :  { %v2014_v13 = vpop.f32.mrf.mxu1 }
0x13b9   :  { %v1623_v14 = vmul.f32 %v1617_v12, %v1617_v12 }
0x13ba   :  { %v1619_v15 = vpop.f32.mrf.mxu1 }
0x13bb   :  { %v1625_v16 = vmul.f32 %v1623_v14, %v1617_v12  ;;  %v1620_v18 = vadd.f32 %v1619_v15, %v1577_v10 }
0x13bc   :  { %v2015_v17 = vpop.f32.mrf.mxu1 }
0x13bd   :  { %v1627_v19 = vmul.f32 0.044715, %v1625_v16  ;;  %v1624_v58 = vmul.f32 %v1620_v18, %v1620_v18 }
0x13bf   :  { %v1629_v24 = vadd.f32 %v1627_v19, %v1617_v12  ;;  %v1626_v25 = vmul.f32 %v1624_v58, %v1620_v18 }
0x13c1   :  { %v1631_v27 = vmul.f32 0.7978846, %v1629_v24  ;;  %v1628_v41 = vmul.f32 0.044715, %v1626_v25 }
0x13c3   :  { %2154 = vtanh.f32 %v1631_v27  ;;  %v1630_v28 = vadd.f32 %v1628_v41, %v1620_v18 }
0x13c5   :  { %v1632_v29 = vmul.f32 0.7978846, %v1630_v28 }
0x13c7   :  { %2156 = vtanh.f32 %v1632_v29 }
0x13d0   :  { %v2155_v30 = vpop.eup %2154 }
0x13d1   :  { %v1635_v62 = vadd.f32 1.0, %v2155_v30 }
0x13d3   :  { %v1637_v33 = vmul.f32 0.5, %v1635_v62 }
0x13d4   :  { %v2157_v31 = vpop.eup %2156 }
0x13d5   :  { %v1636_v35 = vadd.f32 1.0, %v2157_v31  ;;  %v1639_v1 = vmul.f32 %v1637_v33, %v1617_v12 }
0x13d7   :  { %v1638_v36 = vmul.f32 0.5, %v1636_v35 }
0x13d9   :  { %v1640_v53 = vmul.f32 %v1638_v36, %v1620_v18 }
0x13db   :  { %v1641_v26 = vpack.c.bf16 %v1640_v53, %v1639_v1 }
0x13dd   :  { %2025 = vmatmul.mubr.msk.bf16.vlgmr.msra.gmra.mxu0 %vm846_vm4, %v1641_v26 }
0x149d   :  { %v1712_v42 = vpop.f32.mrf.mxu0 }
0x149e   :  { %v1719_v63 = vadd.f32 %v1712_v42, %v2653_v34 }
0x149f   :  { %v2026_v45 = vpop.f32.mrf.mxu0 }
0x14a0   :  { %v1725_v46 = vadd.f32 %v1724_v40, %v1719_v63 }
0x14a1   :  { %v1715_v32 = vpop.f32.mrf.mxu0 }
0x14a2   :  { %v1720_v47 = vadd.f32 %v1715_v32, %v2658_v23  ;;  %v1728_v3 = vsel %vm71_vm0, %v1725_v46, 0.0 }
0x14a3   :  { %1729 = vadd.xlane.f32.xlu0 %v1728_v3  ;;  %v2027_v0 = vpop.f32.mrf.mxu0 }
0x14a4   :  { %v1726_v49 = vadd.f32 %v1724_v40, %v1720_v47 }
0x14a6   :  { %v1731_v51 = vsel %vm71_vm0, %v1726_v49, 0.0 }
0x14a7   :  { %1732 = vadd.xlane.f32.xlu0 %v1731_v51 }
0x152c   :  { %v1730_v52 = vpop.xlane.xlu0 %1729 }
0x152d   :  { %v1734_v55 = vmul.f32 0.03125, %v1730_v52 }
0x152f   :  { %v1736_v60 = vsub.f32 %v1725_v46, %v1734_v55 }
0x1530   :  { %v1733_v56 = vpop.xlane.xlu0 %1732 }
0x1531   :  { %v1735_v54 = vmul.f32 0.03125, %v1733_v56  ;;  %v1738_v61 = vmul.f32 %v1736_v60, %v1736_v60 }
0x1533   :  { %v1737_v34 = vsub.f32 %v1726_v49, %v1735_v54  ;;  %v1740_v50 = vsel %vm71_vm0, %v1738_v61, 0.0 }
0x1534   :  { %1741 = vadd.xlane.f32.xlu0 %v1740_v50 }
0x1535   :  { %v1739_v21 = vmul.f32 %v1737_v34, %v1737_v34 }
0x1537   :  { %v1743_v23 = vsel %vm71_vm0, %v1739_v21, 0.0 }
0x1538   :  { %1744 = vadd.xlane.f32.xlu0 %v1743_v23 }
0x15bd   :  { %v1742_v2 = vpop.xlane.xlu0 %1741 }
0x15be   :  { %v1746_v59 = vmul.f32 0.03125, %v1742_v2 }
0x15c0   :  { %v1748_v48 = vadd.f32 1e-05, %v1746_v59 }
0x15c1   :  { %v1745_v44 = vpop.xlane.xlu0 %1744 }
0x15c2   :  { %2158 = vrsqrt.f32 %v1748_v48  ;;  %v1747_v43 = vmul.f32 0.03125, %v1745_v44 }
0x15c4   :  { %v1749_v37 = vadd.f32 1e-05, %v1747_v43 }
0x15c6   :  { %2160 = vrsqrt.f32 %v1749_v37 }
0x15cf   :  { %v2159_v7 = vpop.eup %2158 }
0x15d0   :  { %v1752_v8 = vmul.f32 %v2159_v7, %v1736_v60 }
0x15d2   :  { %v1758_v38 = vmul.f32 %v1757_v39, %v1752_v8 }
0x15d3   :  { %v2161_v6 = vpop.eup %2160 }
0x15d4   :  { %v1753_v57 = vmul.f32 %v2161_v6, %v1737_v34  ;;  %v1764_v10 = vadd.f32 %v1763_v9, %v1758_v38 }
0x15d6   :  { %v1759_v11 = vmul.f32 %v1757_v39, %v1753_v57  ;;  %1766 = vst.msk [vmem:[#allocation8] sm:$0xff] %vm71_vm0, %v1764_v10 }
0x15d8   :  { %v1765_v12 = vadd.f32 %v1763_v9, %v1759_v11 }
0x15da   :  { %1767 = vst.msk [vmem:[#allocation8 + $0x8] sm:$0xff] %vm71_vm0, %v1765_v12 }
0x15db   :  { %2233 = shalt.err (!%p2230_p5)
}
0x15dc   :  { %1779 = dma.vmem_to_hbm [thread:$0]  %s1774_s11, 256, %s2723_s6, [#allocation4], %s2250_s26, %s2250_s26, %s2251_s27  }
0x15dd   :  { %2246 = dma.done.wait [#allocation4], 256  }
0x15de   :  { %2247 = vsyncadd [#allocation4], 4294967040 }
0x15df   :  { %1783 = vsyncpa [#allocation3], 1 }
0x15e0   :  { %1784 = vsyncpa [#allocation6], 1 }
0x15e1   :  { %1785 = vsyncpa [#allocation4], 1 }

</bundles_post_ra>
